<compile_context>
chip_gen: v7x
topology: tpu7x:2x2x1
jax: 0.10.0
libtpu: 0.0.40
codegen_flags: <defaults>
</compile_context>

<pallas_src>
import jax
import jax.numpy as jnp
from jax.experimental import pallas as pl
from jax.experimental.pallas import tpu as pltpu


def _shift_rows(a, ky, top_mask, bot_mask, axis):
    """shifted[..., y, :] = a[..., y + ky - 1, :] with zero halo outside [0, H).

    The roll wraps exactly the row that the mask zeroes, so roll + mask
    reproduces SAME (zero) padding along the row axis.
    """
    if ky == 1:
        return a
    if ky == 0:      # rows move down by one; row 0 becomes the zero halo
        return jnp.where(top_mask, 0.0, pltpu.roll(a, 1, axis=axis))
    # ky == 2: rows move up by one; row H-1 becomes the zero halo
    return jnp.where(bot_mask, 0.0, pltpu.roll(a, a.shape[axis] - 1, axis=axis))


def _rrnn_kernel(x_ref, wxb_ref, whb_ref, y_ref, xcur):
    """All layers x all timesteps of the conv-RNN for ONE batch element.

    x_ref   : (1, T, H, WC)   layer-0 input, channels zero-padded to Cout,
                              each row flattened row-major as (W, Cout) -> WC
    wxb_ref : (L, 3, WC, WC)  x-path banded conv matrices (one per ky)
    whb_ref : (L, 3, WC, WC)  h-path banded conv matrices (one per ky)
    y_ref   : (1, T, H, WC)   last layer's hidden-state sequence
    xcur    : VMEM (T, H, WC) layer input -> gates0 -> layer output buffer
    """
    _, T, H, WC = x_ref.shape
    L = wxb_ref.shape[0]

    # Hoisted halo masks (row 0 has no row above, row H-1 none below).
    ridx = jax.lax.broadcasted_iota(jnp.int32, (H, WC), 0)
    top_mask = ridx == 0
    bot_mask = ridx == H - 1

    # Fresh layer-0 input every grid step (scratch persists across steps).
    xcur[...] = x_ref[0].astype(jnp.float32)

    for layer in range(L):
        # ---- x-path: gates0 for ALL timesteps in one batch of 3 matmuls. ----
        xin = xcur[...]                                        # (T, H, WC)
        g0 = None
        for ky in range(3):
            lhs = _shift_rows(xin, ky, top_mask, bot_mask, axis=1)
            term = jnp.dot(lhs.reshape(T * H, WC), wxb_ref[layer, ky],
                           preferred_element_type=jnp.float32)
            g0 = term if g0 is None else g0 + term
        # gates0 overwrites the layer input (input no longer needed).
        xcur[...] = g0.reshape(T, H, WC)

        # ---- recurrence: h_t = tanh(gates0_t + conv3x3(h_{t-1})). ----
        wh = [whb_ref[layer, k] for k in range(3)]             # hoisted loads
        last = layer == L - 1
        h = None
        for t in range(T):
            if t == 0:
                h = jnp.tanh(xcur[0])          # h_{-1} = 0  =>  gates1 = 0
            else:
                g1 = None
                for ky in range(3):
                    lhs = _shift_rows(h, ky, top_mask, bot_mask, axis=0)
                    term = jnp.dot(lhs, wh[ky],
                                   preferred_element_type=jnp.float32)
                    g1 = term if g1 is None else g1 + term
                h = jnp.tanh(xcur[t] + g1)
            if last:
                y_ref[0, t] = h.astype(y_ref.dtype)
            else:
                xcur[t] = h                    # becomes next layer's input


def _banded_conv_matrices(w_hwio, W):
    """3x3 HWIO conv kernel -> 3 block-banded matrices, one per ky.

    Row index of B_ky is x_in*Cin + c_in, column index is x_out*Cout + c_out,
    i.e. both sides use the SAME row-major (W, C) flattening as the kernel's
    (H, W*C) feature-map slabs (fragile coupling — keep in sync), and
        conv(x)[y] = sum_ky  x[y + ky - 1] @ B_ky     (zero rows at y = -1, H).
    """
    kh, kw, ci, co = w_hwio.shape
    assert (kh, kw) == (3, 3), "banded formulation assumes 3x3 kernels"
    bands = []
    for ky in range(3):
        b = jnp.zeros((W * ci, W * co), w_hwio.dtype)
        for kx in range(3):
            # contribution uses x_in = x_out + kx - 1  <=>  diagonal k = 1 - kx
            sel = jnp.eye(W, W, k=1 - kx, dtype=w_hwio.dtype)
            b = b + jnp.kron(sel, w_hwio[ky, kx])
        bands.append(b)
    return jnp.stack(bands, axis=0)                            # (3, W*ci, W*co)


@jax.jit
def rrnn_cell_forward(x_nchw, weights):
    """Full RRNNCell forward (all layers), hidden initialised to zeros.

    x_nchw : (N, T, Cin, H, W)  -- PyTorch layout
    weights: tuple of (wx, wh) per layer, HWIO; wx: (3,3,c_in,Cout),
             wh: (3,3,Cout,Cout)
    returns (N, T, Cout, H, W)  -- PyTorch layout
    """
    N, T, Cin, H, W = x_nchw.shape
    Cout = weights[0][0].shape[-1]
    L = len(weights)
    WC = W * Cout
    assert Cin <= Cout, "layer-0 input channels are zero-padded up to Cout"

    # NCHW -> NTHWC, zero-pad channels to Cout, flatten rows to W*Cout lanes.
    x = jnp.transpose(x_nchw, (0, 1, 3, 4, 2)).astype(jnp.float32)
    if Cin < Cout:
        x = jnp.pad(x, ((0, 0), (0, 0), (0, 0), (0, 0), (0, Cout - Cin)))
    x = x.reshape(N, T, H, WC)

    wxb, whb = [], []
    c_in = Cin
    for wx, wh in weights:
        wx = wx.astype(jnp.float32)
        if c_in < Cout:   # match the zero-padded input channels of layer 0
            wx = jnp.pad(wx, ((0, 0), (0, 0), (0, Cout - c_in), (0, 0)))
        wxb.append(_banded_conv_matrices(wx, W))
        whb.append(_banded_conv_matrices(wh.astype(jnp.float32), W))
        c_in = Cout
    wxb = jnp.stack(wxb)                                       # (L, 3, WC, WC)
    whb = jnp.stack(whb)                                       # (L, 3, WC, WC)

    y = pl.pallas_call(
        _rrnn_kernel,
        out_shape=jax.ShapeDtypeStruct((N, T, H, WC), jnp.float32),
        grid_spec=pltpu.PrefetchScalarGridSpec(
            num_scalar_prefetch=0,
            grid=(N,),            # batch elements are independent recurrences
            in_specs=[
                pl.BlockSpec((1, T, H, WC), lambda n: (n, 0, 0, 0)),
                pl.BlockSpec((L, 3, WC, WC), lambda n: (0, 0, 0, 0)),
                pl.BlockSpec((L, 3, WC, WC), lambda n: (0, 0, 0, 0)),
            ],
            out_specs=pl.BlockSpec((1, T, H, WC), lambda n: (n, 0, 0, 0)),
            scratch_shapes=[pltpu.VMEM((T, H, WC), jnp.float32)],
        ),
        compiler_params=pltpu.CompilerParams(
            dimension_semantics=("parallel",)),  # v7x: one TC per batch element
    )(x, wxb, whb)

    # (N, T, H, W*Cout) -> (N, T, Cout, H, W)
    y = y.reshape(N, T, H, W, Cout).transpose(0, 1, 4, 2, 3)
    return y.astype(x_nchw.dtype)


def rrnn_cell_reference(x_nchw, weights):
    """Pure-JAX reference (per-timestep conv_general_dilated) for validation."""
    x = jnp.transpose(x_nchw, (0, 1, 3, 4, 2))  # NHWC
    dn = ('NHWC', 'HWIO', 'NHWC')
    for wx, wh in weights:
        N, T, H, W, _ = x.shape
        Cout = wx.shape[-1]
        h = jnp.zeros((N, H, W, Cout), jnp.float32)
        ys = []
        for j in range(T):
            g0 = jax.lax.conv_general_dilated(x[:, j].astype(jnp.float32), wx,
                                              (1, 1), 'SAME',
                                              dimension_numbers=dn)
            g1 = jax.lax.conv_general_dilated(h, wh, (1, 1), 'SAME',
                                              dimension_numbers=dn)
            h = jnp.tanh(g0 + g1)
            ys.append(h)
        x = jnp.stack(ys, axis=1)
    return jnp.transpose(x, (0, 1, 4, 2, 3))


if __name__ == "__main__":
    # cell_info: input_size=4, output_size=8, kernel_size=3, stride=1,
    #            padding=1, num_layers=2, sharing_rates=0, bias=False,
    #            activation='tanh', dropout=0
    N, T, Cin, H, W = 2, 4, 4, 8, 8
    Cout = 8
    num_layers = 2

    key = jax.random.PRNGKey(0)
    kx, *wkeys = jax.random.split(key, 1 + 2 * num_layers)

    x = jax.random.normal(kx, (N, T, Cin, H, W), dtype=jnp.float32)

    weights = []
    c_in = Cin
    for i in range(num_layers):
        wx = 0.1 * jax.random.normal(wkeys[2 * i], (3, 3, c_in, Cout),
                                     dtype=jnp.float32)
        wh = 0.1 * jax.random.normal(wkeys[2 * i + 1], (3, 3, Cout, Cout),
                                     dtype=jnp.float32)
        weights.append((wx, wh))
        c_in = Cout
    weights = tuple(weights)

    out = rrnn_cell_forward(x, weights)
    out = jax.block_until_ready(out)

    ref = rrnn_cell_reference(x, weights)
    assert out.shape == (N, T, Cout, H, W), out.shape
    if not jnp.allclose(out, ref, atol=1e-4, rtol=1e-4):
        raise AssertionError("Pallas RRNNCell output mismatch vs JAX reference")

    print("KERNEL_OK")
</pallas_src>

<mosaic_0001>
module attributes {stable_mosaic.version = 11 : i64} {
  func.func @_rrnn_kernel(%arg0: i32, %arg1: memref<1x4x8x64xf32, #tpu.memory_space<vmem>>, %arg2: memref<2x3x64x64xf32, #tpu.memory_space<vmem>>, %arg3: memref<2x3x64x64xf32, #tpu.memory_space<vmem>>, %arg4: memref<1x4x8x64xf32, #tpu.memory_space<vmem>>, %arg5: memref<4x8x64xf32, #tpu.memory_space<vmem>>) attributes {dimension_semantics = [#tpu.dimension_semantics<parallel>], iteration_bounds = array<i64: 2>, scalar_prefetch = 0 : i64, scratch_operands = 1 : i64, tpu.core_type = #tpu.core_type<tc>, window_params = [{transform_indices = @transform_0, window_bounds = array<i64: 1, 4, 8, 64>}, {pipeline_mode = #tpu.pipeline_mode<synchronous>, transform_indices = @transform_1, window_bounds = array<i64: 2, 3, 64, 64>}, {pipeline_mode = #tpu.pipeline_mode<synchronous>, transform_indices = @transform_2, window_bounds = array<i64: 2, 3, 64, 64>}, {transform_indices = @transform_3, window_bounds = array<i64: 1, 4, 8, 64>}]} {
    %0 = tpu.iota {dimensions = array<i32: 0>} : vector<8x64xi32>
    %c0_i32 = arith.constant 0 : i32
    %1 = vector.broadcast %c0_i32 : i32 to vector<8x64xi32>
    %2 = arith.cmpi eq, %0, %1 : vector<8x64xi32>
    %c7_i32 = arith.constant 7 : i32
    %3 = vector.broadcast %c7_i32 : i32 to vector<8x64xi32>
    %4 = arith.cmpi eq, %0, %3 : vector<8x64xi32>
    %c0 = arith.constant 0 : index
    %c0_0 = arith.constant 0 : index
    %c0_1 = arith.constant 0 : index
    %c0_2 = arith.constant 0 : index
    %5 = vector.load %arg1[%c0, %c0_0, %c0_1, %c0_2] : memref<1x4x8x64xf32, #tpu.memory_space<vmem>>, vector<1x4x8x64xf32>
    %6 = vector.shape_cast %5 : vector<1x4x8x64xf32> to vector<4x8x64xf32>
    %c0_3 = arith.constant 0 : index
    %c0_4 = arith.constant 0 : index
    %c0_5 = arith.constant 0 : index
    %7 = vector.load %arg5[%c0_3, %c0_4, %c0_5] : memref<4x8x64xf32, #tpu.memory_space<vmem>>, vector<4x8x64xf32>
    tpu.vector_store %arg5[%c0_3, %c0_4, %c0_5], %6 {strides = array<i32>} : memref<4x8x64xf32, #tpu.memory_space<vmem>>, vector<4x8x64xf32>,
    %c0_6 = arith.constant 0 : index
    %c0_7 = arith.constant 0 : index
    %c0_8 = arith.constant 0 : index
    %8 = vector.load %arg5[%c0_6, %c0_7, %c0_8] : memref<4x8x64xf32, #tpu.memory_space<vmem>>, vector<4x8x64xf32>
    %c1_i32 = arith.constant 1 : i32
    %9 = tpu.dynamic_rotate %8 by %c1_i32 dim 1 : vector<4x8x64xf32>, i32 -> vector<4x8x64xf32>
    %cst = arith.constant 0.000000e+00 : f32
    %10 = vector.shape_cast %2 : vector<8x64xi1> to vector<1x8x64xi1>
    %11 = vector.broadcast %10 : vector<1x8x64xi1> to vector<4x8x64xi1>
    %12 = vector.broadcast %cst : f32 to vector<4x8x64xf32>
    %13 = arith.select %11, %12, %9 : vector<4x8x64xi1>, vector<4x8x64xf32>
    %14 = vector.shape_cast %13 : vector<4x8x64xf32> to vector<32x64xf32>
    %c0_9 = arith.constant 0 : index
    %c0_10 = arith.constant 0 : index
    %c0_11 = arith.constant 0 : index
    %c0_12 = arith.constant 0 : index
    %15 = vector.load %arg2[%c0_9, %c0_10, %c0_11, %c0_12] : memref<2x3x64x64xf32, #tpu.memory_space<vmem>>, vector<1x1x64x64xf32>
    %16 = vector.shape_cast %15 : vector<1x1x64x64xf32> to vector<64x64xf32>
    %cst_13 = arith.constant dense<0.000000e+00> : vector<32x64xf32>
    %17 = tpu.matmul %14, %16, %cst_13 {dimension_numbers = #tpu.dot_dimension_numbers<[1], [0], [0], [1], [0, 0, 1, 1], [], []>} : vector<32x64xf32>, vector<64x64xf32>, vector<32x64xf32> -> vector<32x64xf32>
    %18 = vector.shape_cast %8 : vector<4x8x64xf32> to vector<32x64xf32>
    %c0_14 = arith.constant 0 : index
    %c1 = arith.constant 1 : index
    %c0_15 = arith.constant 0 : index
    %c0_16 = arith.constant 0 : index
    %19 = vector.load %arg2[%c0_14, %c1, %c0_15, %c0_16] : memref<2x3x64x64xf32, #tpu.memory_space<vmem>>, vector<1x1x64x64xf32>
    %20 = vector.shape_cast %19 : vector<1x1x64x64xf32> to vector<64x64xf32>
    %cst_17 = arith.constant dense<0.000000e+00> : vector<32x64xf32>
    %21 = tpu.matmul %18, %20, %cst_17 {dimension_numbers = #tpu.dot_dimension_numbers<[1], [0], [0], [1], [0, 0, 1, 1], [], []>} : vector<32x64xf32>, vector<64x64xf32>, vector<32x64xf32> -> vector<32x64xf32>
    %22 = arith.addf %17, %21 : vector<32x64xf32>
    %c7_i32_18 = arith.constant 7 : i32
    %23 = tpu.dynamic_rotate %8 by %c7_i32_18 dim 1 : vector<4x8x64xf32>, i32 -> vector<4x8x64xf32>
    %cst_19 = arith.constant 0.000000e+00 : f32
    %24 = vector.shape_cast %4 : vector<8x64xi1> to vector<1x8x64xi1>
    %25 = vector.broadcast %24 : vector<1x8x64xi1> to vector<4x8x64xi1>
    %26 = vector.broadcast %cst_19 : f32 to vector<4x8x64xf32>
    %27 = arith.select %25, %26, %23 : vector<4x8x64xi1>, vector<4x8x64xf32>
    %28 = vector.shape_cast %27 : vector<4x8x64xf32> to vector<32x64xf32>
    %c0_20 = arith.constant 0 : index
    %c2 = arith.constant 2 : index
    %c0_21 = arith.constant 0 : index
    %c0_22 = arith.constant 0 : index
    %29 = vector.load %arg2[%c0_20, %c2, %c0_21, %c0_22] : memref<2x3x64x64xf32, #tpu.memory_space<vmem>>, vector<1x1x64x64xf32>
    %30 = vector.shape_cast %29 : vector<1x1x64x64xf32> to vector<64x64xf32>
    %cst_23 = arith.constant dense<0.000000e+00> : vector<32x64xf32>
    %31 = tpu.matmul %28, %30, %cst_23 {dimension_numbers = #tpu.dot_dimension_numbers<[1], [0], [0], [1], [0, 0, 1, 1], [], []>} : vector<32x64xf32>, vector<64x64xf32>, vector<32x64xf32> -> vector<32x64xf32>
    %32 = arith.addf %22, %31 : vector<32x64xf32>
    %33 = vector.shape_cast %32 : vector<32x64xf32> to vector<4x8x64xf32>
    %c0_24 = arith.constant 0 : index
    %c0_25 = arith.constant 0 : index
    %c0_26 = arith.constant 0 : index
    %34 = vector.load %arg5[%c0_24, %c0_25, %c0_26] : memref<4x8x64xf32, #tpu.memory_space<vmem>>, vector<4x8x64xf32>
    tpu.vector_store %arg5[%c0_24, %c0_25, %c0_26], %33 {strides = array<i32>} : memref<4x8x64xf32, #tpu.memory_space<vmem>>, vector<4x8x64xf32>,
    %c0_27 = arith.constant 0 : index
    %c0_28 = arith.constant 0 : index
    %c0_29 = arith.constant 0 : index
    %c0_30 = arith.constant 0 : index
    %35 = vector.load %arg3[%c0_27, %c0_28, %c0_29, %c0_30] : memref<2x3x64x64xf32, #tpu.memory_space<vmem>>, vector<1x1x64x64xf32>
    %36 = vector.shape_cast %35 : vector<1x1x64x64xf32> to vector<64x64xf32>
    %c0_31 = arith.constant 0 : index
    %c1_32 = arith.constant 1 : index
    %c0_33 = arith.constant 0 : index
    %c0_34 = arith.constant 0 : index
    %37 = vector.load %arg3[%c0_31, %c1_32, %c0_33, %c0_34] : memref<2x3x64x64xf32, #tpu.memory_space<vmem>>, vector<1x1x64x64xf32>
    %38 = vector.shape_cast %37 : vector<1x1x64x64xf32> to vector<64x64xf32>
    %c0_35 = arith.constant 0 : index
    %c2_36 = arith.constant 2 : index
    %c0_37 = arith.constant 0 : index
    %c0_38 = arith.constant 0 : index
    %39 = vector.load %arg3[%c0_35, %c2_36, %c0_37, %c0_38] : memref<2x3x64x64xf32, #tpu.memory_space<vmem>>, vector<1x1x64x64xf32>
    %40 = vector.shape_cast %39 : vector<1x1x64x64xf32> to vector<64x64xf32>
    %c0_39 = arith.constant 0 : index
    %c0_40 = arith.constant 0 : index
    %c0_41 = arith.constant 0 : index
    %41 = vector.load %arg5[%c0_39, %c0_40, %c0_41] : memref<4x8x64xf32, #tpu.memory_space<vmem>>, vector<1x8x64xf32>
    %42 = vector.shape_cast %41 : vector<1x8x64xf32> to vector<8x64xf32>
    %43 = math.tanh %42 : vector<8x64xf32>
    %c0_42 = arith.constant 0 : index
    %c0_43 = arith.constant 0 : index
    %c0_44 = arith.constant 0 : index
    %44 = vector.load %arg5[%c0_42, %c0_43, %c0_44] : memref<4x8x64xf32, #tpu.memory_space<vmem>>, vector<1x8x64xf32>
    %45 = vector.shape_cast %44 : vector<1x8x64xf32> to vector<8x64xf32>
    %46 = vector.shape_cast %43 : vector<8x64xf32> to vector<1x8x64xf32>
    tpu.vector_store %arg5[%c0_42, %c0_43, %c0_44], %46 {strides = array<i32>} : memref<4x8x64xf32, #tpu.memory_space<vmem>>, vector<1x8x64xf32>,
    %c1_i32_45 = arith.constant 1 : i32
    %47 = tpu.dynamic_rotate %43 by %c1_i32_45 dim 0 : vector<8x64xf32>, i32 -> vector<8x64xf32>
    %cst_46 = arith.constant 0.000000e+00 : f32
    %48 = vector.broadcast %cst_46 : f32 to vector<8x64xf32>
    %49 = arith.select %2, %48, %47 : vector<8x64xi1>, vector<8x64xf32>
    %cst_47 = arith.constant dense<0.000000e+00> : vector<8x64xf32>
    %50 = tpu.matmul %49, %36, %cst_47 {dimension_numbers = #tpu.dot_dimension_numbers<[1], [0], [0], [1], [0, 0, 1, 1], [], []>} : vector<8x64xf32>, vector<64x64xf32>, vector<8x64xf32> -> vector<8x64xf32>
    %cst_48 = arith.constant dense<0.000000e+00> : vector<8x64xf32>
    %51 = tpu.matmul %43, %38, %cst_48 {dimension_numbers = #tpu.dot_dimension_numbers<[1], [0], [0], [1], [0, 0, 1, 1], [], []>} : vector<8x64xf32>, vector<64x64xf32>, vector<8x64xf32> -> vector<8x64xf32>
    %52 = arith.addf %50, %51 : vector<8x64xf32>
    %c7_i32_49 = arith.constant 7 : i32
    %53 = tpu.dynamic_rotate %43 by %c7_i32_49 dim 0 : vector<8x64xf32>, i32 -> vector<8x64xf32>
    %cst_50 = arith.constant 0.000000e+00 : f32
    %54 = vector.broadcast %cst_50 : f32 to vector<8x64xf32>
    %55 = arith.select %4, %54, %53 : vector<8x64xi1>, vector<8x64xf32>
    %cst_51 = arith.constant dense<0.000000e+00> : vector<8x64xf32>
    %56 = tpu.matmul %55, %40, %cst_51 {dimension_numbers = #tpu.dot_dimension_numbers<[1], [0], [0], [1], [0, 0, 1, 1], [], []>} : vector<8x64xf32>, vector<64x64xf32>, vector<8x64xf32> -> vector<8x64xf32>
    %57 = arith.addf %52, %56 : vector<8x64xf32>
    %c1_52 = arith.constant 1 : index
    %c0_53 = arith.constant 0 : index
    %c0_54 = arith.constant 0 : index
    %58 = vector.load %arg5[%c1_52, %c0_53, %c0_54] : memref<4x8x64xf32, #tpu.memory_space<vmem>>, vector<1x8x64xf32>
    %59 = vector.shape_cast %58 : vector<1x8x64xf32> to vector<8x64xf32>
    %60 = arith.addf %59, %57 : vector<8x64xf32>
    %61 = math.tanh %60 : vector<8x64xf32>
    %c1_55 = arith.constant 1 : index
    %c0_56 = arith.constant 0 : index
    %c0_57 = arith.constant 0 : index
    %62 = vector.load %arg5[%c1_55, %c0_56, %c0_57] : memref<4x8x64xf32, #tpu.memory_space<vmem>>, vector<1x8x64xf32>
    %63 = vector.shape_cast %62 : vector<1x8x64xf32> to vector<8x64xf32>
    %64 = vector.shape_cast %61 : vector<8x64xf32> to vector<1x8x64xf32>
    tpu.vector_store %arg5[%c1_55, %c0_56, %c0_57], %64 {strides = array<i32>} : memref<4x8x64xf32, #tpu.memory_space<vmem>>, vector<1x8x64xf32>,
    %c1_i32_58 = arith.constant 1 : i32
    %65 = tpu.dynamic_rotate %61 by %c1_i32_58 dim 0 : vector<8x64xf32>, i32 -> vector<8x64xf32>
    %cst_59 = arith.constant 0.000000e+00 : f32
    %66 = vector.broadcast %cst_59 : f32 to vector<8x64xf32>
    %67 = arith.select %2, %66, %65 : vector<8x64xi1>, vector<8x64xf32>
    %cst_60 = arith.constant dense<0.000000e+00> : vector<8x64xf32>
    %68 = tpu.matmul %67, %36, %cst_60 {dimension_numbers = #tpu.dot_dimension_numbers<[1], [0], [0], [1], [0, 0, 1, 1], [], []>} : vector<8x64xf32>, vector<64x64xf32>, vector<8x64xf32> -> vector<8x64xf32>
    %cst_61 = arith.constant dense<0.000000e+00> : vector<8x64xf32>
    %69 = tpu.matmul %61, %38, %cst_61 {dimension_numbers = #tpu.dot_dimension_numbers<[1], [0], [0], [1], [0, 0, 1, 1], [], []>} : vector<8x64xf32>, vector<64x64xf32>, vector<8x64xf32> -> vector<8x64xf32>
    %70 = arith.addf %68, %69 : vector<8x64xf32>
    %c7_i32_62 = arith.constant 7 : i32
    %71 = tpu.dynamic_rotate %61 by %c7_i32_62 dim 0 : vector<8x64xf32>, i32 -> vector<8x64xf32>
    %cst_63 = arith.constant 0.000000e+00 : f32
    %72 = vector.broadcast %cst_63 : f32 to vector<8x64xf32>
    %73 = arith.select %4, %72, %71 : vector<8x64xi1>, vector<8x64xf32>
    %cst_64 = arith.constant dense<0.000000e+00> : vector<8x64xf32>
    %74 = tpu.matmul %73, %40, %cst_64 {dimension_numbers = #tpu.dot_dimension_numbers<[1], [0], [0], [1], [0, 0, 1, 1], [], []>} : vector<8x64xf32>, vector<64x64xf32>, vector<8x64xf32> -> vector<8x64xf32>
    %75 = arith.addf %70, %74 : vector<8x64xf32>
    %c2_65 = arith.constant 2 : index
    %c0_66 = arith.constant 0 : index
    %c0_67 = arith.constant 0 : index
    %76 = vector.load %arg5[%c2_65, %c0_66, %c0_67] : memref<4x8x64xf32, #tpu.memory_space<vmem>>, vector<1x8x64xf32>
    %77 = vector.shape_cast %76 : vector<1x8x64xf32> to vector<8x64xf32>
    %78 = arith.addf %77, %75 : vector<8x64xf32>
    %79 = math.tanh %78 : vector<8x64xf32>
    %c2_68 = arith.constant 2 : index
    %c0_69 = arith.constant 0 : index
    %c0_70 = arith.constant 0 : index
    %80 = vector.load %arg5[%c2_68, %c0_69, %c0_70] : memref<4x8x64xf32, #tpu.memory_space<vmem>>, vector<1x8x64xf32>
    %81 = vector.shape_cast %80 : vector<1x8x64xf32> to vector<8x64xf32>
    %82 = vector.shape_cast %79 : vector<8x64xf32> to vector<1x8x64xf32>
    tpu.vector_store %arg5[%c2_68, %c0_69, %c0_70], %82 {strides = array<i32>} : memref<4x8x64xf32, #tpu.memory_space<vmem>>, vector<1x8x64xf32>,
    %c1_i32_71 = arith.constant 1 : i32
    %83 = tpu.dynamic_rotate %79 by %c1_i32_71 dim 0 : vector<8x64xf32>, i32 -> vector<8x64xf32>
    %cst_72 = arith.constant 0.000000e+00 : f32
    %84 = vector.broadcast %cst_72 : f32 to vector<8x64xf32>
    %85 = arith.select %2, %84, %83 : vector<8x64xi1>, vector<8x64xf32>
    %cst_73 = arith.constant dense<0.000000e+00> : vector<8x64xf32>
    %86 = tpu.matmul %85, %36, %cst_73 {dimension_numbers = #tpu.dot_dimension_numbers<[1], [0], [0], [1], [0, 0, 1, 1], [], []>} : vector<8x64xf32>, vector<64x64xf32>, vector<8x64xf32> -> vector<8x64xf32>
    %cst_74 = arith.constant dense<0.000000e+00> : vector<8x64xf32>
    %87 = tpu.matmul %79, %38, %cst_74 {dimension_numbers = #tpu.dot_dimension_numbers<[1], [0], [0], [1], [0, 0, 1, 1], [], []>} : vector<8x64xf32>, vector<64x64xf32>, vector<8x64xf32> -> vector<8x64xf32>
    %88 = arith.addf %86, %87 : vector<8x64xf32>
    %c7_i32_75 = arith.constant 7 : i32
    %89 = tpu.dynamic_rotate %79 by %c7_i32_75 dim 0 : vector<8x64xf32>, i32 -> vector<8x64xf32>
    %cst_76 = arith.constant 0.000000e+00 : f32
    %90 = vector.broadcast %cst_76 : f32 to vector<8x64xf32>
    %91 = arith.select %4, %90, %89 : vector<8x64xi1>, vector<8x64xf32>
    %cst_77 = arith.constant dense<0.000000e+00> : vector<8x64xf32>
    %92 = tpu.matmul %91, %40, %cst_77 {dimension_numbers = #tpu.dot_dimension_numbers<[1], [0], [0], [1], [0, 0, 1, 1], [], []>} : vector<8x64xf32>, vector<64x64xf32>, vector<8x64xf32> -> vector<8x64xf32>
    %93 = arith.addf %88, %92 : vector<8x64xf32>
    %c3 = arith.constant 3 : index
    %c0_78 = arith.constant 0 : index
    %c0_79 = arith.constant 0 : index
    %94 = vector.load %arg5[%c3, %c0_78, %c0_79] : memref<4x8x64xf32, #tpu.memory_space<vmem>>, vector<1x8x64xf32>
    %95 = vector.shape_cast %94 : vector<1x8x64xf32> to vector<8x64xf32>
    %96 = arith.addf %95, %93 : vector<8x64xf32>
    %97 = math.tanh %96 : vector<8x64xf32>
    %c3_80 = arith.constant 3 : index
    %c0_81 = arith.constant 0 : index
    %c0_82 = arith.constant 0 : index
    %98 = vector.load %arg5[%c3_80, %c0_81, %c0_82] : memref<4x8x64xf32, #tpu.memory_space<vmem>>, vector<1x8x64xf32>
    %99 = vector.shape_cast %98 : vector<1x8x64xf32> to vector<8x64xf32>
    %100 = vector.shape_cast %97 : vector<8x64xf32> to vector<1x8x64xf32>
    tpu.vector_store %arg5[%c3_80, %c0_81, %c0_82], %100 {strides = array<i32>} : memref<4x8x64xf32, #tpu.memory_space<vmem>>, vector<1x8x64xf32>,
    %c0_83 = arith.constant 0 : index
    %c0_84 = arith.constant 0 : index
    %c0_85 = arith.constant 0 : index
    %101 = vector.load %arg5[%c0_83, %c0_84, %c0_85] : memref<4x8x64xf32, #tpu.memory_space<vmem>>, vector<4x8x64xf32>
    %c1_i32_86 = arith.constant 1 : i32
    %102 = tpu.dynamic_rotate %101 by %c1_i32_86 dim 1 : vector<4x8x64xf32>, i32 -> vector<4x8x64xf32>
    %cst_87 = arith.constant 0.000000e+00 : f32
    %103 = vector.shape_cast %2 : vector<8x64xi1> to vector<1x8x64xi1>
    %104 = vector.broadcast %103 : vector<1x8x64xi1> to vector<4x8x64xi1>
    %105 = vector.broadcast %cst_87 : f32 to vector<4x8x64xf32>
    %106 = arith.select %104, %105, %102 : vector<4x8x64xi1>, vector<4x8x64xf32>
    %107 = vector.shape_cast %106 : vector<4x8x64xf32> to vector<32x64xf32>
    %c1_88 = arith.constant 1 : index
    %c0_89 = arith.constant 0 : index
    %c0_90 = arith.constant 0 : index
    %c0_91 = arith.constant 0 : index
    %108 = vector.load %arg2[%c1_88, %c0_89, %c0_90, %c0_91] : memref<2x3x64x64xf32, #tpu.memory_space<vmem>>, vector<1x1x64x64xf32>
    %109 = vector.shape_cast %108 : vector<1x1x64x64xf32> to vector<64x64xf32>
    %cst_92 = arith.constant dense<0.000000e+00> : vector<32x64xf32>
    %110 = tpu.matmul %107, %109, %cst_92 {dimension_numbers = #tpu.dot_dimension_numbers<[1], [0], [0], [1], [0, 0, 1, 1], [], []>} : vector<32x64xf32>, vector<64x64xf32>, vector<32x64xf32> -> vector<32x64xf32>
    %111 = vector.shape_cast %101 : vector<4x8x64xf32> to vector<32x64xf32>
    %c1_93 = arith.constant 1 : index
    %c1_94 = arith.constant 1 : index
    %c0_95 = arith.constant 0 : index
    %c0_96 = arith.constant 0 : index
    %112 = vector.load %arg2[%c1_93, %c1_94, %c0_95, %c0_96] : memref<2x3x64x64xf32, #tpu.memory_space<vmem>>, vector<1x1x64x64xf32>
    %113 = vector.shape_cast %112 : vector<1x1x64x64xf32> to vector<64x64xf32>
    %cst_97 = arith.constant dense<0.000000e+00> : vector<32x64xf32>
    %114 = tpu.matmul %111, %113, %cst_97 {dimension_numbers = #tpu.dot_dimension_numbers<[1], [0], [0], [1], [0, 0, 1, 1], [], []>} : vector<32x64xf32>, vector<64x64xf32>, vector<32x64xf32> -> vector<32x64xf32>
    %115 = arith.addf %110, %114 : vector<32x64xf32>
    %c7_i32_98 = arith.constant 7 : i32
    %116 = tpu.dynamic_rotate %101 by %c7_i32_98 dim 1 : vector<4x8x64xf32>, i32 -> vector<4x8x64xf32>
    %cst_99 = arith.constant 0.000000e+00 : f32
    %117 = vector.shape_cast %4 : vector<8x64xi1> to vector<1x8x64xi1>
    %118 = vector.broadcast %117 : vector<1x8x64xi1> to vector<4x8x64xi1>
    %119 = vector.broadcast %cst_99 : f32 to vector<4x8x64xf32>
    %120 = arith.select %118, %119, %116 : vector<4x8x64xi1>, vector<4x8x64xf32>
    %121 = vector.shape_cast %120 : vector<4x8x64xf32> to vector<32x64xf32>
    %c1_100 = arith.constant 1 : index
    %c2_101 = arith.constant 2 : index
    %c0_102 = arith.constant 0 : index
    %c0_103 = arith.constant 0 : index
    %122 = vector.load %arg2[%c1_100, %c2_101, %c0_102, %c0_103] : memref<2x3x64x64xf32, #tpu.memory_space<vmem>>, vector<1x1x64x64xf32>
    %123 = vector.shape_cast %122 : vector<1x1x64x64xf32> to vector<64x64xf32>
    %cst_104 = arith.constant dense<0.000000e+00> : vector<32x64xf32>
    %124 = tpu.matmul %121, %123, %cst_104 {dimension_numbers = #tpu.dot_dimension_numbers<[1], [0], [0], [1], [0, 0, 1, 1], [], []>} : vector<32x64xf32>, vector<64x64xf32>, vector<32x64xf32> -> vector<32x64xf32>
    %125 = arith.addf %115, %124 : vector<32x64xf32>
    %126 = vector.shape_cast %125 : vector<32x64xf32> to vector<4x8x64xf32>
    %c0_105 = arith.constant 0 : index
    %c0_106 = arith.constant 0 : index
    %c0_107 = arith.constant 0 : index
    %127 = vector.load %arg5[%c0_105, %c0_106, %c0_107] : memref<4x8x64xf32, #tpu.memory_space<vmem>>, vector<4x8x64xf32>
    tpu.vector_store %arg5[%c0_105, %c0_106, %c0_107], %126 {strides = array<i32>} : memref<4x8x64xf32, #tpu.memory_space<vmem>>, vector<4x8x64xf32>,
    %c1_108 = arith.constant 1 : index
    %c0_109 = arith.constant 0 : index
    %c0_110 = arith.constant 0 : index
    %c0_111 = arith.constant 0 : index
    %128 = vector.load %arg3[%c1_108, %c0_109, %c0_110, %c0_111] : memref<2x3x64x64xf32, #tpu.memory_space<vmem>>, vector<1x1x64x64xf32>
    %129 = vector.shape_cast %128 : vector<1x1x64x64xf32> to vector<64x64xf32>
    %c1_112 = arith.constant 1 : index
    %c1_113 = arith.constant 1 : index
    %c0_114 = arith.constant 0 : index
    %c0_115 = arith.constant 0 : index
    %130 = vector.load %arg3[%c1_112, %c1_113, %c0_114, %c0_115] : memref<2x3x64x64xf32, #tpu.memory_space<vmem>>, vector<1x1x64x64xf32>
    %131 = vector.shape_cast %130 : vector<1x1x64x64xf32> to vector<64x64xf32>
    %c1_116 = arith.constant 1 : index
    %c2_117 = arith.constant 2 : index
    %c0_118 = arith.constant 0 : index
    %c0_119 = arith.constant 0 : index
    %132 = vector.load %arg3[%c1_116, %c2_117, %c0_118, %c0_119] : memref<2x3x64x64xf32, #tpu.memory_space<vmem>>, vector<1x1x64x64xf32>
    %133 = vector.shape_cast %132 : vector<1x1x64x64xf32> to vector<64x64xf32>
    %c0_120 = arith.constant 0 : index
    %c0_121 = arith.constant 0 : index
    %c0_122 = arith.constant 0 : index
    %134 = vector.load %arg5[%c0_120, %c0_121, %c0_122] : memref<4x8x64xf32, #tpu.memory_space<vmem>>, vector<1x8x64xf32>
    %135 = vector.shape_cast %134 : vector<1x8x64xf32> to vector<8x64xf32>
    %136 = math.tanh %135 : vector<8x64xf32>
    %c0_123 = arith.constant 0 : index
    %c0_124 = arith.constant 0 : index
    %c0_125 = arith.constant 0 : index
    %c0_126 = arith.constant 0 : index
    %137 = vector.load %arg4[%c0_123, %c0_124, %c0_125, %c0_126] : memref<1x4x8x64xf32, #tpu.memory_space<vmem>>, vector<1x1x8x64xf32>
    %138 = vector.shape_cast %137 : vector<1x1x8x64xf32> to vector<8x64xf32>
    %139 = vector.shape_cast %136 : vector<8x64xf32> to vector<1x1x8x64xf32>
    tpu.vector_store %arg4[%c0_123, %c0_124, %c0_125, %c0_126], %139 {strides = array<i32>} : memref<1x4x8x64xf32, #tpu.memory_space<vmem>>, vector<1x1x8x64xf32>,
    %c1_i32_127 = arith.constant 1 : i32
    %140 = tpu.dynamic_rotate %136 by %c1_i32_127 dim 0 : vector<8x64xf32>, i32 -> vector<8x64xf32>
    %cst_128 = arith.constant 0.000000e+00 : f32
    %141 = vector.broadcast %cst_128 : f32 to vector<8x64xf32>
    %142 = arith.select %2, %141, %140 : vector<8x64xi1>, vector<8x64xf32>
    %cst_129 = arith.constant dense<0.000000e+00> : vector<8x64xf32>
    %143 = tpu.matmul %142, %129, %cst_129 {dimension_numbers = #tpu.dot_dimension_numbers<[1], [0], [0], [1], [0, 0, 1, 1], [], []>} : vector<8x64xf32>, vector<64x64xf32>, vector<8x64xf32> -> vector<8x64xf32>
    %cst_130 = arith.constant dense<0.000000e+00> : vector<8x64xf32>
    %144 = tpu.matmul %136, %131, %cst_130 {dimension_numbers = #tpu.dot_dimension_numbers<[1], [0], [0], [1], [0, 0, 1, 1], [], []>} : vector<8x64xf32>, vector<64x64xf32>, vector<8x64xf32> -> vector<8x64xf32>
    %145 = arith.addf %143, %144 : vector<8x64xf32>
    %c7_i32_131 = arith.constant 7 : i32
    %146 = tpu.dynamic_rotate %136 by %c7_i32_131 dim 0 : vector<8x64xf32>, i32 -> vector<8x64xf32>
    %cst_132 = arith.constant 0.000000e+00 : f32
    %147 = vector.broadcast %cst_132 : f32 to vector<8x64xf32>
    %148 = arith.select %4, %147, %146 : vector<8x64xi1>, vector<8x64xf32>
    %cst_133 = arith.constant dense<0.000000e+00> : vector<8x64xf32>
    %149 = tpu.matmul %148, %133, %cst_133 {dimension_numbers = #tpu.dot_dimension_numbers<[1], [0], [0], [1], [0, 0, 1, 1], [], []>} : vector<8x64xf32>, vector<64x64xf32>, vector<8x64xf32> -> vector<8x64xf32>
    %150 = arith.addf %145, %149 : vector<8x64xf32>
    %c1_134 = arith.constant 1 : index
    %c0_135 = arith.constant 0 : index
    %c0_136 = arith.constant 0 : index
    %151 = vector.load %arg5[%c1_134, %c0_135, %c0_136] : memref<4x8x64xf32, #tpu.memory_space<vmem>>, vector<1x8x64xf32>
    %152 = vector.shape_cast %151 : vector<1x8x64xf32> to vector<8x64xf32>
    %153 = arith.addf %152, %150 : vector<8x64xf32>
    %154 = math.tanh %153 : vector<8x64xf32>
    %c0_137 = arith.constant 0 : index
    %c1_138 = arith.constant 1 : index
    %c0_139 = arith.constant 0 : index
    %c0_140 = arith.constant 0 : index
    %155 = vector.load %arg4[%c0_137, %c1_138, %c0_139, %c0_140] : memref<1x4x8x64xf32, #tpu.memory_space<vmem>>, vector<1x1x8x64xf32>
    %156 = vector.shape_cast %155 : vector<1x1x8x64xf32> to vector<8x64xf32>
    %157 = vector.shape_cast %154 : vector<8x64xf32> to vector<1x1x8x64xf32>
    tpu.vector_store %arg4[%c0_137, %c1_138, %c0_139, %c0_140], %157 {strides = array<i32>} : memref<1x4x8x64xf32, #tpu.memory_space<vmem>>, vector<1x1x8x64xf32>,
    %c1_i32_141 = arith.constant 1 : i32
    %158 = tpu.dynamic_rotate %154 by %c1_i32_141 dim 0 : vector<8x64xf32>, i32 -> vector<8x64xf32>
    %cst_142 = arith.constant 0.000000e+00 : f32
    %159 = vector.broadcast %cst_142 : f32 to vector<8x64xf32>
    %160 = arith.select %2, %159, %158 : vector<8x64xi1>, vector<8x64xf32>
    %cst_143 = arith.constant dense<0.000000e+00> : vector<8x64xf32>
    %161 = tpu.matmul %160, %129, %cst_143 {dimension_numbers = #tpu.dot_dimension_numbers<[1], [0], [0], [1], [0, 0, 1, 1], [], []>} : vector<8x64xf32>, vector<64x64xf32>, vector<8x64xf32> -> vector<8x64xf32>
    %cst_144 = arith.constant dense<0.000000e+00> : vector<8x64xf32>
    %162 = tpu.matmul %154, %131, %cst_144 {dimension_numbers = #tpu.dot_dimension_numbers<[1], [0], [0], [1], [0, 0, 1, 1], [], []>} : vector<8x64xf32>, vector<64x64xf32>, vector<8x64xf32> -> vector<8x64xf32>
    %163 = arith.addf %161, %162 : vector<8x64xf32>
    %c7_i32_145 = arith.constant 7 : i32
    %164 = tpu.dynamic_rotate %154 by %c7_i32_145 dim 0 : vector<8x64xf32>, i32 -> vector<8x64xf32>
    %cst_146 = arith.constant 0.000000e+00 : f32
    %165 = vector.broadcast %cst_146 : f32 to vector<8x64xf32>
    %166 = arith.select %4, %165, %164 : vector<8x64xi1>, vector<8x64xf32>
    %cst_147 = arith.constant dense<0.000000e+00> : vector<8x64xf32>
    %167 = tpu.matmul %166, %133, %cst_147 {dimension_numbers = #tpu.dot_dimension_numbers<[1], [0], [0], [1], [0, 0, 1, 1], [], []>} : vector<8x64xf32>, vector<64x64xf32>, vector<8x64xf32> -> vector<8x64xf32>
    %168 = arith.addf %163, %167 : vector<8x64xf32>
    %c2_148 = arith.constant 2 : index
    %c0_149 = arith.constant 0 : index
    %c0_150 = arith.constant 0 : index
    %169 = vector.load %arg5[%c2_148, %c0_149, %c0_150] : memref<4x8x64xf32, #tpu.memory_space<vmem>>, vector<1x8x64xf32>
    %170 = vector.shape_cast %169 : vector<1x8x64xf32> to vector<8x64xf32>
    %171 = arith.addf %170, %168 : vector<8x64xf32>
    %172 = math.tanh %171 : vector<8x64xf32>
    %c0_151 = arith.constant 0 : index
    %c2_152 = arith.constant 2 : index
    %c0_153 = arith.constant 0 : index
    %c0_154 = arith.constant 0 : index
    %173 = vector.load %arg4[%c0_151, %c2_152, %c0_153, %c0_154] : memref<1x4x8x64xf32, #tpu.memory_space<vmem>>, vector<1x1x8x64xf32>
    %174 = vector.shape_cast %173 : vector<1x1x8x64xf32> to vector<8x64xf32>
    %175 = vector.shape_cast %172 : vector<8x64xf32> to vector<1x1x8x64xf32>
    tpu.vector_store %arg4[%c0_151, %c2_152, %c0_153, %c0_154], %175 {strides = array<i32>} : memref<1x4x8x64xf32, #tpu.memory_space<vmem>>, vector<1x1x8x64xf32>,
    %c1_i32_155 = arith.constant 1 : i32
    %176 = tpu.dynamic_rotate %172 by %c1_i32_155 dim 0 : vector<8x64xf32>, i32 -> vector<8x64xf32>
    %cst_156 = arith.constant 0.000000e+00 : f32
    %177 = vector.broadcast %cst_156 : f32 to vector<8x64xf32>
    %178 = arith.select %2, %177, %176 : vector<8x64xi1>, vector<8x64xf32>
    %cst_157 = arith.constant dense<0.000000e+00> : vector<8x64xf32>
    %179 = tpu.matmul %178, %129, %cst_157 {dimension_numbers = #tpu.dot_dimension_numbers<[1], [0], [0], [1], [0, 0, 1, 1], [], []>} : vector<8x64xf32>, vector<64x64xf32>, vector<8x64xf32> -> vector<8x64xf32>
    %cst_158 = arith.constant dense<0.000000e+00> : vector<8x64xf32>
    %180 = tpu.matmul %172, %131, %cst_158 {dimension_numbers = #tpu.dot_dimension_numbers<[1], [0], [0], [1], [0, 0, 1, 1], [], []>} : vector<8x64xf32>, vector<64x64xf32>, vector<8x64xf32> -> vector<8x64xf32>
    %181 = arith.addf %179, %180 : vector<8x64xf32>
    %c7_i32_159 = arith.constant 7 : i32
    %182 = tpu.dynamic_rotate %172 by %c7_i32_159 dim 0 : vector<8x64xf32>, i32 -> vector<8x64xf32>
    %cst_160 = arith.constant 0.000000e+00 : f32
    %183 = vector.broadcast %cst_160 : f32 to vector<8x64xf32>
    %184 = arith.select %4, %183, %182 : vector<8x64xi1>, vector<8x64xf32>
    %cst_161 = arith.constant dense<0.000000e+00> : vector<8x64xf32>
    %185 = tpu.matmul %184, %133, %cst_161 {dimension_numbers = #tpu.dot_dimension_numbers<[1], [0], [0], [1], [0, 0, 1, 1], [], []>} : vector<8x64xf32>, vector<64x64xf32>, vector<8x64xf32> -> vector<8x64xf32>
    %186 = arith.addf %181, %185 : vector<8x64xf32>
    %c3_162 = arith.constant 3 : index
    %c0_163 = arith.constant 0 : index
    %c0_164 = arith.constant 0 : index
    %187 = vector.load %arg5[%c3_162, %c0_163, %c0_164] : memref<4x8x64xf32, #tpu.memory_space<vmem>>, vector<1x8x64xf32>
    %188 = vector.shape_cast %187 : vector<1x8x64xf32> to vector<8x64xf32>
    %189 = arith.addf %188, %186 : vector<8x64xf32>
    %190 = math.tanh %189 : vector<8x64xf32>
    %c0_165 = arith.constant 0 : index
    %c3_166 = arith.constant 3 : index
    %c0_167 = arith.constant 0 : index
    %c0_168 = arith.constant 0 : index
    %191 = vector.load %arg4[%c0_165, %c3_166, %c0_167, %c0_168] : memref<1x4x8x64xf32, #tpu.memory_space<vmem>>, vector<1x1x8x64xf32>
    %192 = vector.shape_cast %191 : vector<1x1x8x64xf32> to vector<8x64xf32>
    %193 = vector.shape_cast %190 : vector<8x64xf32> to vector<1x1x8x64xf32>
    tpu.vector_store %arg4[%c0_165, %c3_166, %c0_167, %c0_168], %193 {strides = array<i32>} : memref<1x4x8x64xf32, #tpu.memory_space<vmem>>, vector<1x1x8x64xf32>,
    return
  }
  func.func @transform_0(%arg0: i32) -> (i32, i32, i32, i32) {
    %c0_i32 = arith.constant 0 : i32
    %c0_i32_0 = arith.constant 0 : i32
    %c0_i32_1 = arith.constant 0 : i32
    %c0_i32_2 = arith.constant 0 : i32
    return %arg0, %c0_i32, %c0_i32_0, %c0_i32_1 : i32, i32, i32, i32
  }
  func.func @transform_1(%arg0: i32) -> (i32, i32, i32, i32) {
    %c0_i32 = arith.constant 0 : i32
    %c0_i32_0 = arith.constant 0 : i32
    %c0_i32_1 = arith.constant 0 : i32
    %c0_i32_2 = arith.constant 0 : i32
    %c0_i32_3 = arith.constant 0 : i32
    return %c0_i32, %c0_i32_0, %c0_i32_1, %c0_i32_2 : i32, i32, i32, i32
  }
  func.func @transform_2(%arg0: i32) -> (i32, i32, i32, i32) {
    %c0_i32 = arith.constant 0 : i32
    %c0_i32_0 = arith.constant 0 : i32
    %c0_i32_1 = arith.constant 0 : i32
    %c0_i32_2 = arith.constant 0 : i32
    %c0_i32_3 = arith.constant 0 : i32
    return %c0_i32, %c0_i32_0, %c0_i32_1, %c0_i32_2 : i32, i32, i32, i32
  }
  func.func @transform_3(%arg0: i32) -> (i32, i32, i32, i32) {
    %c0_i32 = arith.constant 0 : i32
    %c0_i32_0 = arith.constant 0 : i32
    %c0_i32_1 = arith.constant 0 : i32
    %c0_i32_2 = arith.constant 0 : i32
    return %arg0, %c0_i32, %c0_i32_0, %c0_i32_1 : i32, i32, i32, i32
  }
}

</mosaic_0001>

<bundles_post_ra>
// kernel: rrnn_cell_forward.1
= control target key start
LH: loop header
LB: loop body
LE: loop exit
PB: predicated region body
PF: predicated region fallthrough
CT: control target
= control target key end

     0   :  { %s3599_s12 = smov 0   ;;  %s4282_s0 = inlined_call_operand.vmem [shape: f32[2,4,8,64], index: 0, kind: input, shape index: {}]   ;;  %s4283_s1 = inlined_call_operand.vmem [shape: f32[2,3,64,64], index: 1, kind: input, shape index: {}]   ;;  %s4284_s2 = inlined_call_operand.vmem [shape: f32[2,3,64,64], index: 2, kind: input, shape index: {}]   ;;  %s4285_s3 = inlined_call_operand.vmem [shape: f32[2,4,8,64], index: 3, kind: output, shape index: {}]  }
   0x1 LB: > { %s2367_s13 = sadd.s32 4294967295, %s3574_s12   ;;  %p2371_p0 = scmp.ge.s32.totalorder %s3574_s12, 1  ;;  %s3574_s12 = sphi %s3599_s12, %s13_s12  }
   0x2   : > { %p137_p1 = scmp.lt.s32.totalorder %s3574_s12, 3 }
   0x4   : > { %p138_p2 = pnand %p2371_p0, %p137_p1 }
   0x5   : > { %v2376_v0 = vld [vmem:[%s4283_s1 + $0x40] sm:$0xff] (!%p138_p2)  ;;  %v2377_v1 = vld [vmem:[%s4283_s1 + $0x48] sm:$0xff] (!%p138_p2)  ;;  %v2378_v2 = vld [vmem:[%s4283_s1 + $0x50] sm:$0xff] (!%p138_p2)  ;;  %p161_p3 = scmp.lt.s32.totalorder (!%p138_p2), %s2367_s13, 1  ;;  %vm179_vm0 = vcmask (!%p138_p2), 523264   ;;  %v171_v18 = vlaneseq (!%p138_p2)  ;;  %vm3577_vm3 = vmmov (!%p138_p2), 0  }
   0x6   : > { %141 = sbr.rel (%p138_p2) target bundleno = 2041 (0x7f9), region = 32  ;;  %v3213_v3 = vpack.c.bf16 (!%p138_p2), %v2377_v1, %v2376_v0  ;;  %v2379_v4 = vld [vmem:[%s4283_s1 + $0x58] sm:$0xff] (!%p138_p2)  ;;  %v2380_v6 = vld [vmem:[%s4283_s1 + $0x60] sm:$0xff] (!%p138_p2)  ;;  %v2381_v7 = vld [vmem:[%s4283_s1 + $0x68] sm:$0xff] (!%p138_p2)  ;;  %v3576_v1 = vmov (!%p138_p2), 0.0|0.0  }
   0x7   : > { %v3217_v5 = vpack.c.bf16 (!%p138_p2), %v2379_v4, %v2378_v2  ;;  %v3221_v8 = vpack.c.bf16 (!%p138_p2), %v2381_v7, %v2380_v6  ;;  %v2382_v9 = vld [vmem:[%s4283_s1 + $0x70] sm:$0xff] (!%p138_p2)  ;;  %v2383_v10 = vld [vmem:[%s4283_s1 + $0x78] sm:$0xff] (!%p138_p2)  ;;  %v198_v16 = vld [vmem:[%s4283_s1] sm:$0xff] (!%p138_p2)  ;;  %v3655_v23 = vshrl.u32 (!%p138_p2), %v171_v18, 7  ;;  %3261 = vmatprep.subr.bf16.mxu1 (!%p138_p2), %v3576_v1 }
   0x8   : > { %3214 = vmatprep.subr.bf16.mxu0 (!%p138_p2), %v3213_v3  ;;  %v3225_v15 = vpack.c.bf16 (!%p138_p2), %v2383_v10, %v2382_v9  ;;  %v199_v17 = vld [vmem:[%s4283_s1 + $0x8] sm:$0xff] (!%p138_p2)  ;;  %v200_v21 = vld [vmem:[%s4283_s1 + $0x10] sm:$0xff] (!%p138_p2)  ;;  %v201_v22 = vld [vmem:[%s4283_s1 + $0x18] sm:$0xff] (!%p138_p2) }
   0x9   : > { %3216 = vmatpush3.bf16.msra.mxu0 (!%p138_p2), %v3213_v3  ;;  %v3229_v19 = vpack.c.bf16 (!%p138_p2), %v199_v17, %v198_v16  ;;  %v3233_v25 = vpack.c.bf16 (!%p138_p2), %v201_v22, %v200_v21  ;;  %v202_v28 = vld [vmem:[%s4283_s1 + $0x20] sm:$0xff] (!%p138_p2)  ;;  %v203_v29 = vld [vmem:[%s4283_s1 + $0x28] sm:$0xff] (!%p138_p2)  ;;  %vm173_vm1 = vcmp.eq.s32.totalorder (!%p138_p2), %v3655_v23, 0  ;;  %v204_v33 = vld [vmem:[%s4283_s1 + $0x30] sm:$0xff] (!%p138_p2)  ;;  %vm174_vm2 = vcmp.eq.s32.totalorder (!%p138_p2), %v3655_v23, 7 }
   0xa   : > { %3218 = vmatprep.subr.bf16.mxu0 (!%p138_p2), %v3217_v5  ;;  %v3237_v31 = vpack.c.bf16 (!%p138_p2), %v203_v29, %v202_v28  ;;  %v205_v34 = vld [vmem:[%s4283_s1 + $0x38] sm:$0xff] (!%p138_p2)  ;;  %v2392_v36 = vld [vmem:[%s4283_s1 + $0x80] sm:$0xff] (!%p138_p2)  ;;  %v2393_v37 = vld [vmem:[%s4283_s1 + $0x88] sm:$0xff] (!%p138_p2) }
   0xb   : > { %v3241_v35 = vpack.c.bf16 (!%p138_p2), %v205_v34, %v204_v33  ;;  %v3245_v39 = vpack.c.bf16 (!%p138_p2), %v2393_v37, %v2392_v36  ;;  %v2394_v41 = vld [vmem:[%s4283_s1 + $0x90] sm:$0xff] (!%p138_p2)  ;;  %v2395_v42 = vld [vmem:[%s4283_s1 + $0x98] sm:$0xff] (!%p138_p2)  ;;  %v2396_v48 = vld [vmem:[%s4283_s1 + $0xa0] sm:$0xff] (!%p138_p2) }
   0xc   : > { %v3249_v45 = vpack.c.bf16 (!%p138_p2), %v2395_v42, %v2394_v41  ;;  %v2397_v49 = vld [vmem:[%s4283_s1 + $0xa8] sm:$0xff] (!%p138_p2)  ;;  %v2398_v53 = vld [vmem:[%s4283_s1 + $0xb0] sm:$0xff] (!%p138_p2)  ;;  %v2399_v54 = vld [vmem:[%s4283_s1 + $0xb8] sm:$0xff] (!%p138_p2) }
   0xd   : > { %s4287_s13 = smov (!%p161_p3, %s2367_s13), 1  ;;  %3220 = vmatpush3.bf16.msra.mxu0 %v3217_v5  ;;  %v3253_v51 = vpack.c.bf16 %v2397_v49, %v2396_v48  ;;  %v3257_v55 = vpack.c.bf16 %v2399_v54, %v2398_v53  ;;  %v2404_v62 = vld [vmem:[%s4284_s2 + $0x40] sm:$0xff]  ;;  %v2405_v63 = vld [vmem:[%s4284_s2 + $0x48] sm:$0xff]  ;;  %v2406_v2 = vld [vmem:[%s4284_s2 + $0x50] sm:$0xff] }
   0xe   : > { %s2503_s26 = sshll.u32 %s4287_s13, 5  ;;  %3222 = vmatprep.subr.bf16.mxu0 %v3221_v8  ;;  %v3729_v0 = vpack.c.bf16 %v2405_v63, %v2404_v62  ;;  %v2407_v3 = vld [vmem:[%s4284_s2 + $0x58] sm:$0xff]  ;;  %v2408_v5 = vld [vmem:[%s4284_s2 + $0x60] sm:$0xff]  ;;  %v2409_v6 = vld [vmem:[%s4284_s2 + $0x68] sm:$0xff] }
   0xf   : > { %s165_s6 = scalar_lea.vmem %s4282_s0, %s2503_s26  ;;  %v3743_v4 = vpack.c.bf16 %v2407_v3, %v2406_v2  ;;  %v3755_v7 = vpack.c.bf16 %v2409_v6, %v2408_v5  ;;  %v2411_v9 = vld [vmem:[%s4284_s2 + $0x78] sm:$0xff]  ;;  %v533_v17 = vld [vmem:[%s4284_s2] sm:$0xff]  ;;  %v534_v18 = vld [vmem:[%s4284_s2 + $0x8] sm:$0xff]  ;;  %s4124_s15 = scalar_lea.vmem %s4285_s3, %s2503_s26 }
  0x10   : > { %v175_v11 = vld [vmem:[%s165_s6] sm:$0xff]  ;;  %v176_v12 = vld [vmem:[%s165_s6 + $0x8] sm:$0xff]  ;;  %v177_v13 = vld [vmem:[%s165_s6 + $0x10] sm:$0xff]  ;;  %3263 = vmatpush3.bf16.msra.mxu1 %v3729_v0 }
  0x11   : > { %180 = vst.msk [vmem:[#allocation2] sm:$0xff] %vm179_vm0, %v175_v11  ;;  %181 = vst.msk [vmem:[#allocation2 + $0x8] sm:$0xff] %vm179_vm0, %v176_v12  ;;  %v178_v14 = vld [vmem:[%s165_s6 + $0x18] sm:$0xff]  ;;  %3224 = vmatpush3.bf16.msra.mxu0 %v3221_v8  ;;  %3264 = vmatprep.subr.bf16.mxu1 %v3576_v1  ;;  %v2410_v8 = vld [vmem:[%s4284_s2 + $0x70] sm:$0xff]  ;;  %v3578_v11 = vmov 0.0  }
  0x12   : > { %182 = vst.msk [vmem:[#allocation2 + $0x10] sm:$0xff] %vm179_vm0, %v177_v13  ;;  %183 = vst.msk [vmem:[#allocation2 + $0x18] sm:$0xff] %vm179_vm0, %v178_v14  ;;  %3226 = vmatprep.subr.bf16.mxu0 %v3225_v15  ;;  %v3767_v10 = vpack.c.bf16 %v2411_v9, %v2410_v8  ;;  %2821 = vmatprep.mubr.msk.f32.mxu1 %vm3577_vm3, %v3578_v11  ;;  %v536_v21 = vld [vmem:[%s4284_s2 + $0x18] sm:$0xff]  ;;  %v539_v28 = vld [vmem:[%s4284_s2 + $0x30] sm:$0xff] }
  0x13   : > { %v540_v29 = vld [vmem:[%s4284_s2 + $0x38] sm:$0xff]  ;;  %v2418_v42 = vld [vmem:[%s4284_s2 + $0xb0] sm:$0xff]  ;;  %v2437_v62 = vld [vmem:[%s4283_s1 + $0x100] sm:$0xff] }
  0x14   : > { %3266 = vmatpush3.bf16.msra.mxu1 %v3743_v4  ;;  %v2415_v36 = vld [vmem:[%s4284_s2 + $0x98] sm:$0xff]  ;;  %v2438_v63 = vld [vmem:[%s4283_s1 + $0x108] sm:$0xff] }
  0x15   : > { %3228 = vmatpush3.bf16.msra.mxu0 %v3225_v15  ;;  %3267 = vmatprep.subr.bf16.mxu1 %v3576_v1 }
  0x16   : > { %3230 = vmatprep.subr.bf16.mxu0 %v3229_v19 }
  0x18   : > { %v184_v20 = vld [vmem:[#allocation2] sm:$0xff]  ;;  %v185_v24 = vld [vmem:[#allocation2 + $0x8] sm:$0xff]  ;;  %3269 = vmatpush3.bf16.msra.mxu1 %v3755_v7 }
  0x19   : > { %2755 = vmatprep.mubr.msk.f32.mxu0 %vm179_vm0, %v184_v20  ;;  %v186_v26 = vld [vmem:[#allocation2 + $0x10] sm:$0xff]  ;;  %v188_v27 = vrot.slane %v184_v20, 7  ;;  %v187_v30 = vld [vmem:[#allocation2 + $0x18] sm:$0xff]  ;;  %v189_v38 = vrot.slane %v185_v24, 7  ;;  %v409_v47 = vrot.slane %v184_v20, 1  ;;  %v410_v56 = vrot.slane %v185_v24, 1  ;;  %3270 = vmatprep.subr.bf16.mxu1 %v3576_v1 }
  0x1a   : > { %2756 = vmatmul.mubr.msk.f32.vlgmr.msra.gmra.mrb[0].mxu0 %vm179_vm0, %v185_v24  ;;  %v190_v40 = vrot.slane %v186_v26, 7  ;;  %v191_v44 = vrot.slane %v187_v30, 7  ;;  %v411_v57 = vrot.slane %v186_v26, 1  ;;  %v412_v59 = vrot.slane %v187_v30, 1  ;;  %v535_v20 = vld [vmem:[%s4284_s2 + $0x10] sm:$0xff] }
  0x1b   : > { %3232 = vmatpush3.bf16.msra.mxu0 %v3229_v19  ;;  %2758 = vmatprep.mubr.msk.f32.mxu0 %vm179_vm0, %v186_v26  ;;  %v194_v32 = vsel %vm173_vm1, 0.0, %v188_v27  ;;  %v195_v43 = vsel %vm173_vm1, 0.0, %v189_v38  ;;  %v415_v52 = vsel %vm174_vm2, 0.0, %v409_v47  ;;  %v416_v58 = vsel %vm174_vm2, 0.0, %v410_v56  ;;  %v538_v26 = vld [vmem:[%s4284_s2 + $0x28] sm:$0xff] }
  0x1c   : > { %3234 = vmatprep.subr.bf16.mxu0 %v3233_v25  ;;  %v196_v46 = vsel %vm173_vm1, 0.0, %v190_v40  ;;  %v197_v50 = vsel %vm173_vm1, 0.0, %v191_v44  ;;  %v417_v60 = vsel %vm174_vm2, 0.0, %v411_v57  ;;  %v418_v61 = vsel %vm174_vm2, 0.0, %v412_v59  ;;  %3272 = vmatpush3.bf16.msra.mxu1 %v3767_v10  ;;  %v2417_v40 = vld [vmem:[%s4284_s2 + $0xa8] sm:$0xff] }
  0x1d   : > { %3273 = vmatprep.subr.bf16.mxu1 %v3576_v1  ;;  %v3787_v19 = vpack.c.bf16 %v534_v18, %v533_v17  ;;  %v3798_v24 = vpack.c.bf16 %v536_v21, %v535_v20  ;;  %v2442_v20 = vld [vmem:[%s4283_s1 + $0x128] sm:$0xff] }
  0x1e   : > { %2759 = vmatmul.mubr.msk.f32.gmra.mrb[2].mxu0 %vm179_vm0, %v187_v30  ;;  %v3820_v30 = vpack.c.bf16 %v540_v29, %v539_v28 }
  0x1f   : > { %3236 = vmatpush3.bf16.msra.mxu0 %v3233_v25  ;;  %2777 = vmatprep.mubr.msk.f32.mxu0 %vm179_vm0, %v194_v32  ;;  %v537_v25 = vld [vmem:[%s4284_s2 + $0x20] sm:$0xff]  ;;  %v2413_v32 = vld [vmem:[%s4284_s2 + $0x88] sm:$0xff] }
  0x20   : > { %3238 = vmatprep.subr.bf16.mxu0 %v3237_v31  ;;  %v3810_v27 = vpack.c.bf16 %v538_v26, %v537_v25  ;;  %v2444_v25 = vld [vmem:[%s4283_s1 + $0x138] sm:$0xff] }
  0x23   : > { %3240 = vmatpush3.bf16.msra.mxu0 %v3237_v31  ;;  %v2412_v31 = vld [vmem:[%s4284_s2 + $0x80] sm:$0xff] }
  0x24   : > { %3242 = vmatprep.subr.bf16.mxu0 %v3241_v35  ;;  %v3830_v34 = vpack.c.bf16 %v2413_v32, %v2412_v31  ;;  %v2429_v31 = vld [vmem:[%s4283_s1 + $0xc0] sm:$0xff]  ;;  %v2430_v32 = vld [vmem:[%s4283_s1 + $0xc8] sm:$0xff] }
  0x27   : > { %3244 = vmatpush3.bf16.msra.mxu0 %v3241_v35  ;;  %v2414_v35 = vld [vmem:[%s4284_s2 + $0x90] sm:$0xff] }
  0x28   : > { %3246 = vmatprep.subr.bf16.mxu0 %v3245_v39  ;;  %v3843_v38 = vpack.c.bf16 %v2415_v36, %v2414_v35  ;;  %v2432_v35 = vld [vmem:[%s4283_s1 + $0xd8] sm:$0xff] }
  0x2a   : > { %2778 = vmatmul.mubr.msk.f32.vlgmr.msra.gmra.mrb[0].mxu0 %vm179_vm0, %v195_v43  ;;  %v2419_v43 = vld [vmem:[%s4284_s2 + $0xb8] sm:$0xff] }
  0x2b   : > { %3248 = vmatpush3.bf16.msra.mxu0 %v3245_v39  ;;  %2780 = vmatprep.mubr.msk.f32.mxu0 %vm179_vm0, %v196_v46  ;;  %v2416_v39 = vld [vmem:[%s4284_s2 + $0xa0] sm:$0xff]  ;;  %v3865_v44 = vpack.c.bf16 %v2419_v43, %v2418_v42 }
  0x2c   : > { %3250 = vmatprep.subr.bf16.mxu0 %v3249_v45  ;;  %v3855_v41 = vpack.c.bf16 %v2417_v40, %v2416_v39  ;;  %v2435_v39 = vld [vmem:[%s4283_s1 + $0xf0] sm:$0xff]  ;;  %v2453_v43 = vld [vmem:[%s4283_s1 + $0x140] sm:$0xff] }
  0x2e   : > { %2781 = vmatmul.mubr.msk.f32.gmra.mrb[2].mxu0 %vm179_vm0, %v197_v50 }
  0x2f   : > { %3252 = vmatpush3.bf16.msra.mxu0 %v3249_v45  ;;  %2799 = vmatprep.mubr.msk.f32.mxu0 %vm179_vm0, %v415_v52 }
  0x30   : > { %3254 = vmatprep.subr.bf16.mxu0 %v3253_v51 }
  0x33   : > { %3256 = vmatpush3.bf16.msra.mxu0 %v3253_v51 }
  0x34   : > { %3258 = vmatprep.subr.bf16.mxu0 %v3257_v55 }
  0x37   : > { %3260 = vmatpush3.bf16.msra.mxu0 %v3257_v55 }
  0x38   : > { %3297 = vmatprep.subr.bf16.mxu0 %v3576_v1 }
  0x3a   : > { %2800 = vmatmul.mubr.msk.f32.vlgmr.msra.gmra.mrb[0].mxu0 %vm179_vm0, %v416_v58 }
  0x3b   : > { %2802 = vmatprep.mubr.msk.f32.mxu0 %vm179_vm0, %v417_v60  ;;  %3299 = vmatpush3.bf16.msra.mxu0 %v3729_v0 }
  0x3c   : > { %3300 = vmatprep.subr.bf16.mxu0 %v3576_v1 }
  0x3e   : > { %2803 = vmatmul.mubr.msk.f32.gmra.mrb[2].mxu0 %vm179_vm0, %v418_v61 }
  0x3f   : > { %3302 = vmatpush3.bf16.msra.mxu0 %v3743_v4  ;;  %2878 = vmatprep.mubr.msk.f32.mxu0 %vm3577_vm3, %v3578_v11 }
  0x40   : > { %3303 = vmatprep.subr.bf16.mxu0 %v3576_v1 }
  0x43   : > { %3305 = vmatpush3.bf16.msra.mxu0 %v3755_v7 }
  0x44   : > { %3306 = vmatprep.subr.bf16.mxu0 %v3576_v1 }
  0x47   : > { %3308 = vmatpush3.bf16.msra.mxu0 %v3767_v10 }
  0x48   : > { %3321 = vmatprep.subr.bf16.mxu0 %v3576_v1 }
 0x10d   : > { %v2801_v12 = vpop.f32.mrb[0].mxu0 }
 0x10e   : > { %530 = vst.msk [vmem:[#allocation2 + $0x8] sm:$0xff] %vm179_vm0, %v2801_v12  ;;  %v506_v13 = vpop.f32.mrb[1].mxu0 }
 0x10f   : > { %529 = vst.msk [vmem:[#allocation2] sm:$0xff] %vm179_vm0, %v506_v13  ;;  %v2439_v13 = vld [vmem:[%s4283_s1 + $0x110] sm:$0xff] }
 0x111   : > { %v2804_v14 = vpop.f32.mrb[2].mxu0 }
 0x112   : > { %532 = vst.msk [vmem:[#allocation2 + $0x18] sm:$0xff] %vm179_vm0, %v2804_v14  ;;  %v516_v15 = vpop.f32.mrb[3].mxu0  ;;  %v2440_v14 = vld [vmem:[%s4283_s1 + $0x118] sm:$0xff] }
 0x113   : > { %531 = vst.msk [vmem:[#allocation2 + $0x10] sm:$0xff] %vm179_vm0, %v516_v15  ;;  %v3373_v17 = vpack.c.bf16 %v2440_v14, %v2439_v13 }
 0x115   : > { %v787_v55 = vld [vmem:[#allocation2 + $0x8] sm:$0xff] }
 0x116   : > { %v559_v16 = vld [vmem:[#allocation2] sm:$0xff] }
 0x117   : > { %3552 = vtanh.f32 %v559_v16 }
 0x121   : > { %v3553_v22 = vpop.eup %3552 }
 0x122   : > { %561 = vst.msk [vmem:[#allocation2] sm:$0xff] %vm179_vm0, %v3553_v22  ;;  %2822 = vmatmul.mubr.msk.f32.vlgmr.msra.gmra.mrb[0].mxu1 %vm179_vm0, %v3553_v22  ;;  %v562_v33 = vrot.slane %v3553_v22, 7  ;;  %v710_v45 = vrot.slane %v3553_v22, 1 }
 0x123   : > { %3275 = vmatpush3.bf16.msra.mxu1 %v3787_v19  ;;  %2840 = vmatprep.mubr.msk.f32.mxu1 %vm3577_vm3, %v3578_v11 }
 0x124   : > { %3276 = vmatprep.subr.bf16.mxu1 %v3576_v1  ;;  %v563_v37 = vsel %vm173_vm1, 0.0, %v562_v33  ;;  %v711_v46 = vsel %vm174_vm2, 0.0, %v710_v45  ;;  %v3385_v33 = vpack.c.bf16 %v2430_v32, %v2429_v31  ;;  %v2480_v32 = vld [vmem:[%s4284_s2 + $0x138] sm:$0xff] }
 0x127   : > { %3278 = vmatpush3.bf16.msra.mxu1 %v3798_v24 }
 0x128   : > { %3279 = vmatprep.subr.bf16.mxu1 %v3576_v1 }
 0x129   : > { %v3947_v21 = vld [vmem:[#allocation2] sm:$0xff] }
 0x12b   : > { %3281 = vmatpush3.bf16.msra.mxu1 %v3810_v27 }
 0x12c   : > { %3282 = vmatprep.subr.bf16.mxu1 %v3576_v1 }
 0x12f   : > { %3284 = vmatpush3.bf16.msra.mxu1 %v3820_v30 }
 0x130   : > { %3285 = vmatprep.subr.bf16.mxu1 %v3576_v1 }
 0x132   : > { %2841 = vmatmul.mubr.msk.f32.vlgmr.msra.gmra.mrb[2].mxu1 %vm179_vm0, %v563_v37  ;;  %v2433_v37 = vld [vmem:[%s4283_s1 + $0xe0] sm:$0xff] }
 0x133   : > { %3287 = vmatpush3.bf16.msra.mxu1 %v3830_v34  ;;  %2859 = vmatprep.mubr.msk.f32.mxu1 %vm3577_vm3, %v3578_v11 }
 0x134   : > { %3288 = vmatprep.subr.bf16.mxu1 %v3576_v1 }
 0x137   : > { %3290 = vmatpush3.bf16.msra.mxu1 %v3843_v38 }
 0x138   : > { %3291 = vmatprep.subr.bf16.mxu1 %v3576_v1 }
 0x13b   : > { %3293 = vmatpush3.bf16.msra.mxu1 %v3855_v41 }
 0x13c   : > { %3294 = vmatprep.subr.bf16.mxu1 %v3576_v1 }
 0x13f   : > { %3296 = vmatpush3.bf16.msra.mxu1 %v3865_v44 }
 0x140   : > { %3309 = vmatprep.subr.bf16.mxu1 %v3576_v1 }
 0x142   : > { %2860 = vmatmul.mubr.msk.f32.vlgmr.msra.gmra.mrb[4].mxu1 %vm179_vm0, %v711_v46 }
 0x143   : > { %3311 = vmatpush3.bf16.msra.mxu1 %v3787_v19  ;;  %2897 = vmatprep.mubr.msk.f32.mxu1 %vm3577_vm3, %v3578_v11 }
 0x144   : > { %3312 = vmatprep.subr.bf16.mxu1 %v3576_v1 }
 0x147   : > { %3314 = vmatpush3.bf16.msra.mxu1 %v3798_v24 }
 0x148   : > { %3315 = vmatprep.subr.bf16.mxu1 %v3576_v1 }
 0x14b   : > { %3317 = vmatpush3.bf16.msra.mxu1 %v3810_v27 }
 0x14c   : > { %3318 = vmatprep.subr.bf16.mxu1 %v3576_v1 }
 0x14f   : > { %3320 = vmatpush3.bf16.msra.mxu1 %v3820_v30 }
 0x150   : > { %3333 = vmatprep.subr.bf16.mxu1 %v3576_v1 }
 0x1f5   : > { %v633_v47 = vpop.f32.mrb[0].mxu1 }
 0x1f6   : > { %v2823_v48 = vpop.f32.mrb[1].mxu1 }
 0x205   : > { %v706_v49 = vpop.f32.mrb[2].mxu1 }
 0x206   : > { %v707_v50 = vadd.f32 %v706_v49, %v633_v47  ;;  %v2842_v51 = vpop.f32.mrb[3].mxu1 }
 0x215   : > { %v781_v52 = vpop.f32.mrb[4].mxu1 }
 0x216   : > { %v785_v53 = vadd.f32 %v781_v52, %v707_v50  ;;  %v2861_v54 = vpop.f32.mrb[5].mxu1 }
 0x217   : > { %v1245_v54 = vld [vmem:[#allocation2 + $0x18] sm:$0xff] }
 0x218   : > { %v788_v56 = vadd.f32 %v787_v55, %v785_v53 }
 0x21a   : > { %3554 = vtanh.f32 %v788_v56 }
 0x224   : > { %v3555_v57 = vpop.eup %3554 }
 0x225   : > { %790 = vst.msk [vmem:[#allocation2 + $0x8] sm:$0xff] %vm179_vm0, %v3555_v57  ;;  %2879 = vmatmul.mubr.msk.f32.vlgmr.msra.gmra.mrb[4].mxu0 %vm179_vm0, %v3555_v57  ;;  %v791_v58 = vrot.slane %v3555_v57, 7  ;;  %v939_v60 = vrot.slane %v3555_v57, 1  ;;  %v1253_v57 = vrot.slane %v3947_v21, 7 }
 0x226   : > { %3323 = vmatpush3.bf16.msra.mxu0 %v3830_v34  ;;  %2916 = vmatprep.mubr.msk.f32.mxu0 %vm3577_vm3, %v3578_v11 }
 0x227   : > { %v792_v59 = vsel %vm173_vm1, 0.0, %v791_v58  ;;  %3324 = vmatprep.subr.bf16.mxu0 %v3576_v1  ;;  %v940_v61 = vsel %vm174_vm2, 0.0, %v939_v60  ;;  %v2455_v60 = vld [vmem:[%s4283_s1 + $0x150] sm:$0xff] }
 0x228   : > { %2898 = vmatmul.mubr.msk.f32.vlgmr.msra.gmra.mrb[6].mxu1 %vm179_vm0, %v792_v59 }
 0x229   : > { %3335 = vmatpush3.bf16.msra.mxu1 %v3729_v0  ;;  %2935 = vmatprep.mubr.msk.f32.mxu1 %vm3577_vm3, %v3578_v11  ;;  %v3369_v0 = vpack.c.bf16 %v2438_v63, %v2437_v62  ;;  %v1257_v62 = vsel %vm173_vm1, 0.0, %v1253_v57  ;;  %v2484_v57 = vld [vmem:[%s4284_s2 + $0x158] sm:$0xff] }
 0x22a   : > { %3326 = vmatpush3.bf16.msra.mxu0 %v3843_v38  ;;  %3336 = vmatprep.subr.bf16.mxu1 %v3576_v1 }
 0x22b   : > { %3327 = vmatprep.subr.bf16.mxu0 %v3576_v1 }
 0x22c   : > { %v3968_v29 = vld [vmem:[#allocation2 + $0x8] sm:$0xff] }
 0x22d   : > { %3338 = vmatpush3.bf16.msra.mxu1 %v3743_v4  ;;  %v1254_v58 = vrot.slane %v3968_v29, 7 }
 0x22e   : > { %3329 = vmatpush3.bf16.msra.mxu0 %v3855_v41  ;;  %3339 = vmatprep.subr.bf16.mxu1 %v3576_v1 }
 0x22f   : > { %3330 = vmatprep.subr.bf16.mxu0 %v3576_v1 }
 0x231   : > { %3341 = vmatpush3.bf16.msra.mxu1 %v3755_v7 }
 0x232   : > { %3332 = vmatpush3.bf16.msra.mxu0 %v3865_v44  ;;  %3342 = vmatprep.subr.bf16.mxu1 %v3576_v1 }
 0x233   : > { %3345 = vmatprep.subr.bf16.mxu0 %v3576_v1 }
 0x235   : > { %2917 = vmatmul.mubr.msk.f32.vlgmr.msra.gmra.mrb[6].mxu0 %vm179_vm0, %v940_v61  ;;  %3344 = vmatpush3.bf16.msra.mxu1 %v3767_v10  ;;  %v1016_v10 = vld [vmem:[#allocation2 + $0x10] sm:$0xff]  ;;  %v2456_v61 = vld [vmem:[%s4283_s1 + $0x158] sm:$0xff] }
 0x236   : > { %3347 = vmatpush3.bf16.msra.mxu0 %v3787_v19  ;;  %3357 = vmatprep.subr.bf16.mxu1 %v3576_v1  ;;  %v2441_v19 = vld [vmem:[%s4283_s1 + $0x120] sm:$0xff] }
 0x237   : > { %3348 = vmatprep.subr.bf16.mxu0 %v3576_v1  ;;  %2954 = vmatprep.mubr.msk.f32.mxu0 %vm3577_vm3, %v3578_v11  ;;  %v3377_v22 = vpack.c.bf16 %v2442_v20, %v2441_v19 }
 0x23a   : > { %3350 = vmatpush3.bf16.msra.mxu0 %v3798_v24  ;;  %v2443_v24 = vld [vmem:[%s4283_s1 + $0x130] sm:$0xff] }
 0x23b   : > { %3351 = vmatprep.subr.bf16.mxu0 %v3576_v1  ;;  %v3381_v26 = vpack.c.bf16 %v2444_v25, %v2443_v24  ;;  %v2475_v25 = vld [vmem:[%s4284_s2 + $0x110] sm:$0xff] }
 0x23e   : > { %3353 = vmatpush3.bf16.msra.mxu0 %v3810_v27 }
 0x23f   : > { %3354 = vmatprep.subr.bf16.mxu0 %v3576_v1 }
 0x242   : > { %3356 = vmatpush3.bf16.msra.mxu0 %v3820_v30 }
 0x243   : > { %3370 = vmatprep.subr.bf16.mxu0 %v3369_v0 }
 0x2f8   : > { %v862_v2 = vpop.f32.mrb[4].mxu0 }
 0x2f9   : > { %v2880_v3 = vpop.f32.mrb[5].mxu0 }
 0x2fb   : > { %v935_v4 = vpop.f32.mrb[6].mxu1 }
 0x2fc   : > { %v936_v5 = vadd.f32 %v935_v4, %v862_v2  ;;  %v2899_v6 = vpop.f32.mrb[7].mxu1  ;;  %v1258_v2 = vsel %vm173_vm1, 0.0, %v1254_v58  ;;  %v2457_v4 = vld [vmem:[%s4283_s1 + $0x160] sm:$0xff] }
 0x308   : > { %v1010_v7 = vpop.f32.mrb[6].mxu0 }
 0x309   : > { %v1014_v8 = vadd.f32 %v1010_v7, %v936_v5  ;;  %v2918_v9 = vpop.f32.mrb[7].mxu0  ;;  %v2458_v5 = vld [vmem:[%s4283_s1 + $0x168] sm:$0xff]  ;;  %v1473_v7 = vrot.slane %v3947_v21, 1 }
 0x30b   : > { %v1017_v12 = vadd.f32 %v1016_v10, %v1014_v8  ;;  %v3409_v8 = vpack.c.bf16 %v2458_v5, %v2457_v4  ;;  %v2459_v10 = vld [vmem:[%s4283_s1 + $0x170] sm:$0xff]  ;;  %v1477_v13 = vsel %vm174_vm2, 0.0, %v1473_v7 }
 0x30d   : > { %3556 = vtanh.f32 %v1017_v12  ;;  %v2460_v12 = vld [vmem:[%s4283_s1 + $0x178] sm:$0xff] }
 0x30e   : > { %v3413_v14 = vpack.c.bf16 %v2460_v12, %v2459_v10 }
 0x317   : > { %v3557_v15 = vpop.eup %3556 }
 0x318   : > { %1019 = vst.msk [vmem:[#allocation2 + $0x10] sm:$0xff] %vm179_vm0, %v3557_v15  ;;  %2936 = vmatmul.mubr.msk.f32.vlgmr.msra.gmra.mrb[8].mxu1 %vm179_vm0, %v3557_v15  ;;  %v1020_v16 = vrot.slane %v3557_v15, 7  ;;  %v1168_v27 = vrot.slane %v3557_v15, 1  ;;  %v1474_v15 = vrot.slane %v3968_v29, 1 }
 0x319   : > { %3359 = vmatpush3.bf16.msra.mxu1 %v3830_v34  ;;  %2973 = vmatprep.mubr.msk.f32.mxu1 %vm3577_vm3, %v3578_v11  ;;  %v2431_v34 = vld [vmem:[%s4283_s1 + $0xd0] sm:$0xff] }
 0x31a   : > { %v1021_v18 = vsel %vm173_vm1, 0.0, %v1020_v16  ;;  %3360 = vmatprep.subr.bf16.mxu1 %v3576_v1  ;;  %v1169_v28 = vsel %vm174_vm2, 0.0, %v1168_v27  ;;  %v3389_v36 = vpack.c.bf16 %v2432_v35, %v2431_v34 }
 0x31b   : > { %2955 = vmatmul.mubr.msk.f32.vlgmr.msra.gmra.mrb[8].mxu0 %vm179_vm0, %v1021_v18 }
 0x31c   : > { %3372 = vmatpush3.bf16.msra.mxu0 %v3369_v0  ;;  %2992 = vmatprep.mubr.msk.f32.mxu0 %vm179_vm0, %v3947_v21  ;;  %v3405_v0 = vpack.c.bf16 %v2456_v61, %v2455_v60  ;;  %v2473_v21 = vld [vmem:[%s4284_s2 + $0x100] sm:$0xff]  ;;  %v2486_v61 = vld [vmem:[%s4284_s2 + $0x168] sm:$0xff] }
 0x31d   : > { %3362 = vmatpush3.bf16.msra.mxu1 %v3843_v38  ;;  %3374 = vmatprep.subr.bf16.mxu0 %v3373_v17  ;;  %v2434_v38 = vld [vmem:[%s4283_s1 + $0xe8] sm:$0xff]  ;;  %v2485_v60 = vld [vmem:[%s4284_s2 + $0x160] sm:$0xff] }
 0x31e   : > { %3363 = vmatprep.subr.bf16.mxu1 %v3576_v1  ;;  %v3393_v40 = vpack.c.bf16 %v2434_v38, %v2433_v37 }
 0x31f   : > { %v3972_v30 = vld [vmem:[#allocation2 + $0x10] sm:$0xff] }
 0x320   : > { %3376 = vmatpush3.bf16.msra.mxu0 %v3373_v17  ;;  %v1255_v63 = vrot.slane %v3972_v30, 7  ;;  %v1475_v16 = vrot.slane %v3972_v30, 1  ;;  %v1478_v17 = vsel %vm174_vm2, 0.0, %v1474_v15 }
 0x321   : > { %3365 = vmatpush3.bf16.msra.mxu1 %v3855_v41  ;;  %3378 = vmatprep.subr.bf16.mxu0 %v3377_v22  ;;  %v2436_v41 = vld [vmem:[%s4283_s1 + $0xf8] sm:$0xff] }
 0x322   : > { %3366 = vmatprep.subr.bf16.mxu1 %v3576_v1  ;;  %v3397_v42 = vpack.c.bf16 %v2436_v41, %v2435_v39  ;;  %v1259_v6 = vsel %vm173_vm1, 0.0, %v1255_v63  ;;  %v1479_v19 = vsel %vm174_vm2, 0.0, %v1475_v16  ;;  %v2465_v39 = vld [vmem:[%s4284_s2 + $0xc0] sm:$0xff]  ;;  %v2487_v63 = vld [vmem:[%s4284_s2 + $0x170] sm:$0xff] }
 0x324   : > { %3380 = vmatpush3.bf16.msra.mxu0 %v3377_v22  ;;  %v2474_v22 = vld [vmem:[%s4284_s2 + $0x108] sm:$0xff] }
 0x325   : > { %3368 = vmatpush3.bf16.msra.mxu1 %v3865_v44  ;;  %3382 = vmatprep.subr.bf16.mxu0 %v3381_v26  ;;  %v2454_v44 = vld [vmem:[%s4283_s1 + $0x148] sm:$0xff]  ;;  %v4065_v24 = vpack.c.bf16 %v2474_v22, %v2473_v21 }
 0x326   : > { %3417 = vmatprep.subr.bf16.mxu1 %v3576_v1  ;;  %v3401_v45 = vpack.c.bf16 %v2454_v44, %v2453_v43  ;;  %v2468_v43 = vld [vmem:[%s4284_s2 + $0xd8] sm:$0xff] }
 0x328   : > { %2974 = vmatmul.mubr.msk.f32.vlgmr.msra.gmra.mrb[10].mxu1 %vm179_vm0, %v1169_v28  ;;  %3384 = vmatpush3.bf16.msra.mxu0 %v3381_v26  ;;  %v2476_v26 = vld [vmem:[%s4284_s2 + $0x118] sm:$0xff]  ;;  %v2477_v28 = vld [vmem:[%s4284_s2 + $0x120] sm:$0xff] }
 0x329   : > { %3058 = vmatprep.mubr.msk.f32.mxu1 %vm3577_vm3, %v3578_v11  ;;  %3386 = vmatprep.subr.bf16.mxu0 %v3385_v33  ;;  %v4077_v27 = vpack.c.bf16 %v2476_v26, %v2475_v25 }
 0x32a   : > { %3419 = vmatpush3.bf16.msra.mxu1 %v4065_v24 }
 0x32b   : > { %2993 = vmatmul.mubr.msk.f32.vlgmr.msra.gmra.mrb[10].mxu0 %vm179_vm0, %v3968_v29  ;;  %3420 = vmatprep.subr.bf16.mxu1 %v3576_v1  ;;  %v2478_v29 = vld [vmem:[%s4284_s2 + $0x128] sm:$0xff] }
 0x32c   : > { %2995 = vmatprep.mubr.msk.f32.mxu0 %vm179_vm0, %v3972_v30  ;;  %3388 = vmatpush3.bf16.msra.mxu0 %v3385_v33  ;;  %v2479_v30 = vld [vmem:[%s4284_s2 + $0x130] sm:$0xff]  ;;  %v4092_v31 = vpack.c.bf16 %v2478_v29, %v2477_v28 }
 0x32d   : > { %3390 = vmatprep.subr.bf16.mxu0 %v3389_v36  ;;  %v4098_v33 = vpack.c.bf16 %v2480_v32, %v2479_v30 }
 0x32e   : > { %3422 = vmatpush3.bf16.msra.mxu1 %v4077_v27 }
 0x32f   : > { %3423 = vmatprep.subr.bf16.mxu1 %v3576_v1 }
 0x330   : > { %3392 = vmatpush3.bf16.msra.mxu0 %v3389_v36 }
 0x331   : > { %3394 = vmatprep.subr.bf16.mxu0 %v3393_v40 }
 0x332   : > { %3425 = vmatpush3.bf16.msra.mxu1 %v4092_v31 }
 0x333   : > { %3426 = vmatprep.subr.bf16.mxu1 %v3576_v1 }
 0x334   : > { %3396 = vmatpush3.bf16.msra.mxu0 %v3393_v40  ;;  %v2466_v40 = vld [vmem:[%s4284_s2 + $0xc8] sm:$0xff] }
 0x335   : > { %3398 = vmatprep.subr.bf16.mxu0 %v3397_v42  ;;  %v4117_v41 = vpack.c.bf16 %v2466_v40, %v2465_v39 }
 0x336   : > { %3428 = vmatpush3.bf16.msra.mxu1 %v4098_v33 }
 0x337   : > { %3429 = vmatprep.subr.bf16.mxu1 %v3576_v1 }
 0x338   : > { %3400 = vmatpush3.bf16.msra.mxu0 %v3397_v42  ;;  %v2467_v42 = vld [vmem:[%s4284_s2 + $0xd0] sm:$0xff] }
 0x339   : > { %3402 = vmatprep.subr.bf16.mxu0 %v3401_v45 }
 0x3eb   : > { %v1091_v46 = vpop.f32.mrb[8].mxu1 }
 0x3ec   : > { %v2937_v47 = vpop.f32.mrb[9].mxu1 }
 0x3ed   : > { %v2470_v47 = vld [vmem:[%s4284_s2 + $0xe8] sm:$0xff] }
 0x3ee   : > { %v1164_v48 = vpop.f32.mrb[8].mxu0 }
 0x3ef   : > { %v1165_v49 = vadd.f32 %v1164_v48, %v1091_v46  ;;  %v2956_v50 = vpop.f32.mrb[9].mxu0  ;;  %v2469_v46 = vld [vmem:[%s4284_s2 + $0xe0] sm:$0xff] }
 0x3f0   : > { %v4148_v48 = vpack.c.bf16 %v2470_v47, %v2469_v46  ;;  %v2472_v50 = vld [vmem:[%s4284_s2 + $0xf8] sm:$0xff] }
 0x3fb   : > { %v1239_v51 = vpop.f32.mrb[10].mxu1 }
 0x3fc   : > { %v1243_v52 = vadd.f32 %v1239_v51, %v1165_v49  ;;  %v2975_v53 = vpop.f32.mrb[11].mxu1  ;;  %v2471_v49 = vld [vmem:[%s4284_s2 + $0xf0] sm:$0xff] }
 0x3fd   : > { %v4158_v51 = vpack.c.bf16 %v2472_v50, %v2471_v49  ;;  %v2482_v53 = vld [vmem:[%s4284_s2 + $0x148] sm:$0xff] }
 0x3fe   : > { %v1246_v55 = vadd.f32 %v1245_v54, %v1243_v52  ;;  %v2481_v52 = vld [vmem:[%s4284_s2 + $0x140] sm:$0xff] }
 0x400   : > { %3558 = vtanh.f32 %v1246_v55  ;;  %v4168_v55 = vpack.c.bf16 %v2482_v53, %v2481_v52 }
 0x40a   : > { %v3559_v56 = vpop.eup %3558 }
 0x40b   : > { %1248 = vst.msk [vmem:[#allocation2 + $0x18] sm:$0xff] %vm179_vm0, %v3559_v56  ;;  %v2483_v56 = vld [vmem:[%s4284_s2 + $0x150] sm:$0xff] }
 0x412   : > { %v1252_v59 = vld [vmem:[#allocation2 + $0x18] sm:$0xff] }
 0x413   : > { %2996 = vmatmul.mubr.msk.f32.gmra.mrb[12].mxu0 %vm179_vm0, %v1252_v59  ;;  %v1256_v3 = vrot.slane %v1252_v59, 7  ;;  %v1476_v18 = vrot.slane %v1252_v59, 1  ;;  %v4181_v59 = vpack.c.bf16 %v2484_v57, %v2483_v56 }
 0x414   : > { %3014 = vmatprep.mubr.msk.f32.mxu0 %vm179_vm0, %v1257_v62  ;;  %v4193_v62 = vpack.c.bf16 %v2486_v61, %v2485_v60 }
 0x415   : > { %v1260_v9 = vsel %vm173_vm1, 0.0, %v1256_v3  ;;  %v1480_v20 = vsel %vm174_vm2, 0.0, %v1476_v18 }
 0x417   : > { %3015 = vmatmul.mubr.msk.f32.vlgmr.msra.gmra.mrb[10].mxu0 %vm179_vm0, %v1258_v2 }
 0x418   : > { %3404 = vmatpush3.bf16.msra.mxu0 %v3401_v45  ;;  %3017 = vmatprep.mubr.msk.f32.mxu0 %vm179_vm0, %v1259_v6  ;;  %v4136_v45 = vpack.c.bf16 %v2468_v43, %v2467_v42 }
 0x419   : > { %3406 = vmatprep.subr.bf16.mxu0 %v3405_v0 }
 0x41b   : > { %3018 = vmatmul.mubr.msk.f32.gmra.mrb[12].mxu0 %vm179_vm0, %v1260_v9 }
 0x41c   : > { %3408 = vmatpush3.bf16.msra.mxu0 %v3405_v0  ;;  %3036 = vmatprep.mubr.msk.f32.mxu0 %vm179_vm0, %v1477_v13  ;;  %v2488_v0 = vld [vmem:[%s4284_s2 + $0x178] sm:$0xff] }
 0x41d   : > { %3410 = vmatprep.subr.bf16.mxu0 %v3409_v8  ;;  %v4203_v2 = vpack.c.bf16 %v2488_v0, %v2487_v63 }
 0x420   : > { %3412 = vmatpush3.bf16.msra.mxu0 %v3409_v8 }
 0x421   : > { %3414 = vmatprep.subr.bf16.mxu0 %v3413_v14 }
 0x424   : > { %3416 = vmatpush3.bf16.msra.mxu0 %v3413_v14 }
 0x425   : > { %3453 = vmatprep.subr.bf16.mxu0 %v3576_v1 }
 0x427   : > { %3037 = vmatmul.mubr.msk.f32.vlgmr.msra.gmra.mrb[10].mxu0 %vm179_vm0, %v1478_v17 }
 0x428   : > { %3039 = vmatprep.mubr.msk.f32.mxu0 %vm179_vm0, %v1479_v19  ;;  %3455 = vmatpush3.bf16.msra.mxu0 %v4065_v24 }
 0x429   : > { %3456 = vmatprep.subr.bf16.mxu0 %v3576_v1 }
 0x42b   : > { %3040 = vmatmul.mubr.msk.f32.gmra.mrb[12].mxu0 %vm179_vm0, %v1480_v20 }
 0x42c   : > { %3115 = vmatprep.mubr.msk.f32.mxu0 %vm3577_vm3, %v3578_v11  ;;  %3458 = vmatpush3.bf16.msra.mxu0 %v4077_v27 }
 0x42d   : > { %3459 = vmatprep.subr.bf16.mxu0 %v3576_v1 }
 0x430   : > { %3461 = vmatpush3.bf16.msra.mxu0 %v4092_v31 }
 0x431   : > { %3462 = vmatprep.subr.bf16.mxu0 %v3576_v1 }
 0x434   : > { %3464 = vmatpush3.bf16.msra.mxu0 %v4098_v33 }
 0x435   : > { %3477 = vmatprep.subr.bf16.mxu0 %v3576_v1 }
 0x4fa   : > { %v3038_v34 = vpop.f32.mrb[10].mxu0 }
 0x4fb   : > { %1592 = vst.msk [vmem:[#allocation2 + $0x8] sm:$0xff] %vm179_vm0, %v3038_v34  ;;  %v1568_v35 = vpop.f32.mrb[11].mxu0 }
 0x4fc   : > { %1591 = vst.msk [vmem:[#allocation2] sm:$0xff] %vm179_vm0, %v1568_v35 }
 0x4fe   : > { %v3041_v36 = vpop.f32.mrb[12].mxu0 }
 0x4ff   : > { %1594 = vst.msk [vmem:[#allocation2 + $0x18] sm:$0xff] %vm179_vm0, %v3041_v36  ;;  %v1578_v37 = vpop.f32.mrb[13].mxu0 }
 0x500   : > { %1593 = vst.msk [vmem:[#allocation2 + $0x10] sm:$0xff] %vm179_vm0, %v1578_v37 }
 0x502   : > { %v1849_v14 = vld [vmem:[#allocation2 + $0x8] sm:$0xff] }
 0x503   : > { %v1622_v38 = vld [vmem:[#allocation2] sm:$0xff] }
 0x504   : > { %3560 = vtanh.f32 %v1622_v38 }
 0x507   : > { %v2078_v30 = vld [vmem:[#allocation2 + $0x10] sm:$0xff] }
 0x50e   : > { %v3561_v44 = vpop.eup %3560 }
 0x50f   : > { %3059 = vmatmul.mubr.msk.f32.vlgmr.msra.gmra.mrb[12].mxu1 %vm179_vm0, %v3561_v44  ;;  %1624 = vst.msk [vmem:[%s4124_s15] sm:$0xff] %vm179_vm0, %v3561_v44  ;;  %v1625_v54 = vrot.slane %v3561_v44, 7  ;;  %v1773_v3 = vrot.slane %v3561_v44, 1  ;;  %v2307_v44 = vld [vmem:[#allocation2 + $0x18] sm:$0xff] }
 0x510   : > { %3431 = vmatpush3.bf16.msra.mxu1 %v4117_v41  ;;  %3077 = vmatprep.mubr.msk.f32.mxu1 %vm3577_vm3, %v3578_v11 }
 0x511   : > { %3432 = vmatprep.subr.bf16.mxu1 %v3576_v1  ;;  %v1626_v58 = vsel %vm173_vm1, 0.0, %v1625_v54  ;;  %v1774_v4 = vsel %vm174_vm2, 0.0, %v1773_v3 }
 0x514   : > { %3434 = vmatpush3.bf16.msra.mxu1 %v4136_v45 }
 0x515   : > { %3435 = vmatprep.subr.bf16.mxu1 %v3576_v1 }
 0x518   : > { %3437 = vmatpush3.bf16.msra.mxu1 %v4148_v48 }
 0x519   : > { %3438 = vmatprep.subr.bf16.mxu1 %v3576_v1 }
 0x51c   : > { %3440 = vmatpush3.bf16.msra.mxu1 %v4158_v51 }
 0x51d   : > { %3441 = vmatprep.subr.bf16.mxu1 %v3576_v1 }
 0x51f   : > { %3078 = vmatmul.mubr.msk.f32.vlgmr.msra.gmra.mrb[14].mxu1 %vm179_vm0, %v1626_v58 }
 0x520   : > { %3443 = vmatpush3.bf16.msra.mxu1 %v4168_v55  ;;  %3096 = vmatprep.mubr.msk.f32.mxu1 %vm3577_vm3, %v3578_v11 }
 0x521   : > { %3444 = vmatprep.subr.bf16.mxu1 %v3576_v1 }
 0x524   : > { %3446 = vmatpush3.bf16.msra.mxu1 %v4181_v59 }
 0x525   : > { %3447 = vmatprep.subr.bf16.mxu1 %v3576_v1 }
 0x528   : > { %3449 = vmatpush3.bf16.msra.mxu1 %v4193_v62 }
 0x529   : > { %3450 = vmatprep.subr.bf16.mxu1 %v3576_v1 }
 0x52c   : > { %3452 = vmatpush3.bf16.msra.mxu1 %v4203_v2 }
 0x52d   : > { %3465 = vmatprep.subr.bf16.mxu1 %v3576_v1 }
 0x52f   : > { %3097 = vmatmul.mubr.msk.f32.vlgmr.msra.gmra.mrb[16].mxu1 %vm179_vm0, %v1774_v4 }
 0x530   : > { %3467 = vmatpush3.bf16.msra.mxu1 %v4117_v41  ;;  %3134 = vmatprep.mubr.msk.f32.mxu1 %vm3577_vm3, %v3578_v11 }
 0x531   : > { %3468 = vmatprep.subr.bf16.mxu1 %v3576_v1 }
 0x534   : > { %3470 = vmatpush3.bf16.msra.mxu1 %v4136_v45 }
 0x535   : > { %3471 = vmatprep.subr.bf16.mxu1 %v3576_v1 }
 0x538   : > { %3473 = vmatpush3.bf16.msra.mxu1 %v4148_v48 }
 0x539   : > { %3474 = vmatprep.subr.bf16.mxu1 %v3576_v1 }
 0x53c   : > { %3476 = vmatpush3.bf16.msra.mxu1 %v4158_v51 }
 0x53d   : > { %3489 = vmatprep.subr.bf16.mxu1 %v3576_v1 }
 0x5e2   : > { %v1696_v5 = vpop.f32.mrb[12].mxu1 }
 0x5e3   : > { %v3060_v6 = vpop.f32.mrb[13].mxu1 }
 0x5f2   : > { %v1769_v7 = vpop.f32.mrb[14].mxu1 }
 0x5f3   : > { %v1770_v8 = vadd.f32 %v1769_v7, %v1696_v5  ;;  %v3079_v9 = vpop.f32.mrb[15].mxu1 }
 0x602   : > { %v1844_v10 = vpop.f32.mrb[16].mxu1 }
 0x603   : > { %v1848_v12 = vadd.f32 %v1844_v10, %v1770_v8  ;;  %v3098_v13 = vpop.f32.mrb[17].mxu1 }
 0x605   : > { %v1850_v15 = vadd.f32 %v1849_v14, %v1848_v12 }
 0x607   : > { %3562 = vtanh.f32 %v1850_v15 }
 0x611   : > { %v3563_v16 = vpop.eup %3562 }
 0x612   : > { %3116 = vmatmul.mubr.msk.f32.vlgmr.msra.gmra.mrb[14].mxu0 %vm179_vm0, %v3563_v16  ;;  %v1854_v17 = vrot.slane %v3563_v16, 7  ;;  %2492 = vst.msk [vmem:[%s4124_s15 + $0x8] sm:$0xff] %vm179_vm0, %v3563_v16  ;;  %v2002_v19 = vrot.slane %v3563_v16, 1 }
 0x613   : > { %3479 = vmatpush3.bf16.msra.mxu0 %v4168_v55  ;;  %3153 = vmatprep.mubr.msk.f32.mxu0 %vm3577_vm3, %v3578_v11 }
 0x614   : > { %v1855_v18 = vsel %vm173_vm1, 0.0, %v1854_v17  ;;  %3480 = vmatprep.subr.bf16.mxu0 %v3576_v1  ;;  %v2003_v20 = vsel %vm174_vm2, 0.0, %v2002_v19 }
 0x615   : > { %3135 = vmatmul.mubr.msk.f32.vlgmr.msra.gmra.mrb[18].mxu1 %vm179_vm0, %v1855_v18 }
 0x616   : > { %3491 = vmatpush3.bf16.msra.mxu1 %v4065_v24  ;;  %3172 = vmatprep.mubr.msk.f32.mxu1 %vm3577_vm3, %v3578_v11 }
 0x617   : > { %3482 = vmatpush3.bf16.msra.mxu0 %v4181_v59  ;;  %3492 = vmatprep.subr.bf16.mxu1 %v3576_v1 }
 0x618   : > { %3483 = vmatprep.subr.bf16.mxu0 %v3576_v1 }
 0x61a   : > { %3494 = vmatpush3.bf16.msra.mxu1 %v4077_v27 }
 0x61b   : > { %3485 = vmatpush3.bf16.msra.mxu0 %v4193_v62  ;;  %3495 = vmatprep.subr.bf16.mxu1 %v3576_v1 }
 0x61c   : > { %3486 = vmatprep.subr.bf16.mxu0 %v3576_v1 }
 0x61e   : > { %3497 = vmatpush3.bf16.msra.mxu1 %v4092_v31 }
 0x61f   : > { %3488 = vmatpush3.bf16.msra.mxu0 %v4203_v2  ;;  %3498 = vmatprep.subr.bf16.mxu1 %v3576_v1 }
 0x620   : > { %3501 = vmatprep.subr.bf16.mxu0 %v3576_v1 }
 0x622   : > { %3154 = vmatmul.mubr.msk.f32.vlgmr.msra.gmra.mrb[16].mxu0 %vm179_vm0, %v2003_v20  ;;  %3500 = vmatpush3.bf16.msra.mxu1 %v4098_v33 }
 0x623   : > { %3503 = vmatpush3.bf16.msra.mxu0 %v4117_v41  ;;  %3513 = vmatprep.subr.bf16.mxu1 %v3576_v1 }
 0x624   : > { %3504 = vmatprep.subr.bf16.mxu0 %v3576_v1  ;;  %3191 = vmatprep.mubr.msk.f32.mxu0 %vm3577_vm3, %v3578_v11 }
 0x627   : > { %3506 = vmatpush3.bf16.msra.mxu0 %v4136_v45 }
 0x628   : > { %3507 = vmatprep.subr.bf16.mxu0 %v3576_v1 }
 0x62b   : > { %3509 = vmatpush3.bf16.msra.mxu0 %v4148_v48 }
 0x62c   : > { %3510 = vmatprep.subr.bf16.mxu0 %v3576_v1 }
 0x62f   : > { %3512 = vmatpush3.bf16.msra.mxu0 %v4158_v51 }
 0x6e5   : > { %v1925_v21 = vpop.f32.mrb[14].mxu0 }
 0x6e6   : > { %v3117_v22 = vpop.f32.mrb[15].mxu0 }
 0x6e8   : > { %v1998_v24 = vpop.f32.mrb[18].mxu1 }
 0x6e9   : > { %v1999_v25 = vadd.f32 %v1998_v24, %v1925_v21  ;;  %v3136_v26 = vpop.f32.mrb[19].mxu1 }
 0x6f5   : > { %v2073_v27 = vpop.f32.mrb[16].mxu0 }
 0x6f6   : > { %v2077_v28 = vadd.f32 %v2073_v27, %v1999_v25  ;;  %v3155_v29 = vpop.f32.mrb[17].mxu0 }
 0x6f8   : > { %v2079_v31 = vadd.f32 %v2078_v30, %v2077_v28 }
 0x6fa   : > { %3564 = vtanh.f32 %v2079_v31 }
 0x704   : > { %v3565_v32 = vpop.eup %3564 }
 0x705   : > { %3173 = vmatmul.mubr.msk.f32.vlgmr.msra.gmra.mrb[20].mxu1 %vm179_vm0, %v3565_v32  ;;  %v2083_v33 = vrot.slane %v3565_v32, 7  ;;  %2496 = vst.msk [vmem:[%s4124_s15 + $0x10] sm:$0xff] %vm179_vm0, %v3565_v32  ;;  %v2231_v35 = vrot.slane %v3565_v32, 1 }
 0x706   : > { %3515 = vmatpush3.bf16.msra.mxu1 %v4168_v55  ;;  %3210 = vmatprep.mubr.msk.f32.mxu1 %vm3577_vm3, %v3578_v11 }
 0x707   : > { %v2084_v34 = vsel %vm173_vm1, 0.0, %v2083_v33  ;;  %3516 = vmatprep.subr.bf16.mxu1 %v3576_v1  ;;  %v2232_v11 = vsel %vm174_vm2, 0.0, %v2231_v35 }
 0x708   : > { %3192 = vmatmul.mubr.msk.f32.vlgmr.msra.gmra.mrb[18].mxu0 %vm179_vm0, %v2084_v34 }
 0x70a   : > { %3518 = vmatpush3.bf16.msra.mxu1 %v4181_v59 }
 0x70b   : > { %3519 = vmatprep.subr.bf16.mxu1 %v3576_v1 }
 0x70e   : > { %3521 = vmatpush3.bf16.msra.mxu1 %v4193_v62 }
 0x70f   : > { %3522 = vmatprep.subr.bf16.mxu1 %v3576_v1 }
 0x712   : > { %3524 = vmatpush3.bf16.msra.mxu1 %v4203_v2 }
 0x715   : > { %3211 = vmatmul.mubr.msk.f32.vlgmr.msra.gmra.mrb[22].mxu1 %vm179_vm0, %v2232_v11 }
 0x7d8   : > { %v2154_v36 = vpop.f32.mrb[20].mxu1 }
 0x7d9   : > { %v3174_v37 = vpop.f32.mrb[21].mxu1 }
 0x7db   : > { %v2227_v38 = vpop.f32.mrb[18].mxu0 }
 0x7dc   : > { %v2228_v39 = vadd.f32 %v2227_v38, %v2154_v36  ;;  %v3193_v40 = vpop.f32.mrb[19].mxu0 }
 0x7e8   : > { %v2302_v41 = vpop.f32.mrb[22].mxu1 }
 0x7e9   : > { %v2306_v42 = vadd.f32 %v2302_v41, %v2228_v39  ;;  %v3212_v43 = vpop.f32.mrb[23].mxu1 }
 0x7eb   : > { %v2308_v45 = vadd.f32 %v2307_v44, %v2306_v42 }
 0x7ed   : > { %3566 = vtanh.f32 %v2308_v45 }
 0x7f7   : > { %v3567_v1 = vpop.eup %3566 }
 0x7f8   : > { %2500 = vst.msk [vmem:[%s4124_s15 + $0x18] sm:$0xff] %vm179_vm0, %v3567_v1 }
 0x7f9 PF: > { %s13_s12 = sadd.s32 1, %s3574_s12  }
 0x7fa   : > { %p10_p4 = scmp.ge.s32.totalorder %s13_s12, 4  }
 0x7fc   :  { %12 = sbr.rel (!%p10_p4) target bundleno = 1 (0x1), region = 78 }

</bundles_post_ra>
